<compile_context>
chip_gen: v6e
topology: v6e:2x2x1
jax: 0.10.0
libtpu: 0.0.40
codegen_flags: <defaults>
</compile_context>

<pallas_src>
import functools

import numpy as np
import jax
import jax.numpy as jnp
from jax.experimental import pallas as pl
from jax.experimental.pallas import tpu as pltpu


def _spline_knots(degree, num_knots):
    """Mirrors BSL.knots_distribution + sklearn SplineTransformer knot padding."""
    base = np.concatenate([
        np.linspace(-0.002, -0.001, degree),
        np.linspace(0.0, 1.0, num_knots - 2 * degree - 2),
        np.linspace(1.001, 1.002, degree),
    ]).astype(np.float64)
    dist_min = base[1] - base[0]
    dist_max = base[-1] - base[-2]
    ext = np.concatenate([
        base[0] - dist_min * np.arange(degree, 0, -1),
        base,
        base[-1] + dist_max * np.arange(1, degree + 1),
    ])
    # The constant-folding / pruning in the kernel relies on the knot vector
    # extending strictly past [0, 1] on both sides.
    assert base[0] < 0.0 and base[-1] > 1.0
    assert ext[0] < base[0] and ext[-1] > base[-1]
    return tuple(float(v) for v in ext)


def _tree_sum(terms):
    """Pairwise (tree) reduction to expose ILP instead of one serial add chain."""
    while len(terms) > 1:
        nxt = [terms[i] + terms[i + 1] for i in range(0, len(terms) - 1, 2)]
        if len(terms) % 2:
            nxt.append(terms[-1])
        terms = nxt
    return terms[0]


def _spline_block(xn, cp_ref, cb_ref, row0, knots, degree, num_neurons):
    """bias + sum_k B_k^degree(xn) * cp[:, k] for one BSL block.

    xn: (num_neurons, LC), one sample per lane, with 0 <= xn <= 1 + few ulp
    (NormLayer output).  The constant folding / pruning below is only valid
    under that range assumption.
    cp_ref[row0 + j, k] = control point of basis k for neuron j (this block).
    cb_ref[row0 + j, 0] = spline bias for neuron j (this block).
    """
    t = knots
    n_ext = len(t)
    f32 = jnp.float32
    one, zero = f32(1.0), f32(0.0)
    HI = 1.001  # smallest knot strictly above any reachable xn (xn <= 1 + ~2^-22)

    # ---- degree 0 with constant-folded comparisons (xn >= 0, xn < HI) ------
    ge_cache = {}

    def ge(i):  # xn >= t[i]; Python bool when foldable, else a traced array
        if t[i] <= 0.0:
            return True
        if t[i] >= HI:
            return False
        if i not in ge_cache:
            ge_cache[i] = xn >= f32(t[i])
        return ge_cache[i]

    basis = []
    for i in range(n_ext - 1):
        if t[i + 1] <= 0.0 or t[i] >= HI:
            basis.append(None)                       # support misses [0, 1]
            continue
        lo, hi = ge(i), ge(i + 1)
        if lo is True and hi is False:               # never hit for these knots
            basis.append(jnp.full_like(xn, one))
        elif lo is True:
            basis.append(jnp.where(hi, zero, one))   # == (xn < t[i+1])
        elif hi is False:
            basis.append(jnp.where(lo, one, zero))   # == (xn >= t[i])
        else:
            basis.append(jnp.where(lo & jnp.logical_not(hi), one, zero))

    # ---- trace-time use counts for dx(i) = xn - t[i]: cache only if reused --
    dx_uses = {}
    alive = [b is not None for b in basis]
    for k in range(1, degree + 1):
        nxt_alive = []
        for i in range(n_ext - 1 - k):
            u1 = (t[i + k] - t[i]) != 0.0 and alive[i]
            u2 = (t[i + k + 1] - t[i + 1]) != 0.0 and alive[i + 1]
            if u1:
                dx_uses[i] = dx_uses.get(i, 0) + 1
            if u2:
                dx_uses[i + k + 1] = dx_uses.get(i + k + 1, 0) + 1
            nxt_alive.append(u1 or u2)
        alive = nxt_alive

    dx_cache = {}

    def dx(i):
        if dx_uses.get(i, 0) > 1:
            if i not in dx_cache:
                dx_cache[i] = xn - f32(t[i])
            return dx_cache[i]
        return xn - f32(t[i])          # single use: do not extend a live range

    # ---- levels 1..degree; contract the final level immediately -------------
    n_acc = 4
    accs, n_prod = [], 0
    for k in range(1, degree + 1):
        last = (k == degree)
        nxt = []
        for i in range(n_ext - 1 - k):
            term = None
            d1 = t[i + k] - t[i]
            if d1 != 0.0 and basis[i] is not None:
                term = (dx(i) * f32(1.0 / d1)) * basis[i]
            d2 = t[i + k + 1] - t[i + 1]
            if d2 != 0.0 and basis[i + 1] is not None:
                c = (dx(i + k + 1) * f32(-1.0 / d2)) * basis[i + 1]
                term = c if term is None else term + c
            if not last:
                nxt.append(term)
            elif term is not None:
                # Final basis i: multiply by its (num_neurons, 1) control-point
                # column (broadcast over lanes) and retire it into a rotating
                # accumulator so at most n_acc partial sums stay live.
                col = cp_ref[row0:row0 + num_neurons, i:i + 1]
                prod = term * col
                if len(accs) < n_acc:
                    accs.append(prod)
                else:
                    slot = n_prod % n_acc
                    accs[slot] = accs[slot] + prod
                n_prod += 1
        basis = nxt

    bias = cb_ref[row0:row0 + num_neurons, :]          # (num_neurons, 1)
    if not accs:                                       # defensive; never hit
        return jnp.zeros_like(xn) + bias
    return _tree_sum(accs) + bias


def dps_kernel(xt_ref, w1_ref, b1_ref, cp_ref, cb_ref, w2_ref, b2_ref, ot_ref,
               *, knots, degree, num_bsl, num_neurons, chunks):
    def chunk_body(c, carry):
        # ln1: (N, in) @ (in, LC) -> (N, LC).  Tiny MXU op; negligible vs the
        # VALU-bound spline math (review: leave the matmuls alone).
        h = jnp.dot(w1_ref[...], xt_ref[c],
                    preferred_element_type=jnp.float32) + b1_ref[...]

        for blk in range(num_bsl):
            # NormLayer: per-sample (per-lane) min-max over the neuron
            # (sublane) axis.  No epsilon guard, matching PyTorch: a constant
            # column produces garbage confined to that sample's lane.
            mn = jnp.min(h, axis=0, keepdims=True)          # (1, LC)
            mx = jnp.max(h, axis=0, keepdims=True)
            rng = mx - mn
            inv = pl.reciprocal(rng, approx=True)           # EUP slot
            inv = inv * (2.0 - rng * inv)                    # Newton -> ~1 ulp
            xn = (h - mn) * inv                              # in [0, 1 + ~2^-22]
            h = _spline_block(xn, cp_ref, cb_ref, blk * num_neurons,
                              knots, degree, num_neurons)
            # Dropout: identity in the forward / eval pass.

        # ln2: (out, N) @ (N, LC) -> lane-dense (out, 128) store.
        ot_ref[c] = jnp.dot(w2_ref[...], h,
                            preferred_element_type=jnp.float32) + b2_ref[...]
        return carry

    if chunks == 1:
        chunk_body(0, 0)
    else:
        # fori_loop (not a Python for) bounds live ranges per chunk.
        jax.lax.fori_loop(0, chunks, chunk_body, 0)


def dps_forward(x, params, *, degree, num_knots, num_bsl,
                lane_chunk=128, chunks_per_tile=8):
    """DPS forward.  params use PyTorch layouts:
       w1 (N, in), b1 (N,), cp (num_bsl, num_knots, N), cb (num_bsl, N),
       w2 (out, N), b2 (out,)."""
    B, input_dim = x.shape
    w1, b1 = params["w1"], params["b1"]
    cp, cb = params["cp"], params["cb"]
    w2, b2 = params["w2"], params["b2"]
    num_neurons = w1.shape[0]
    out_dim = w2.shape[0]

    knots = _spline_knots(degree, num_knots)
    assert len(knots) - 1 - degree == num_knots, "degree/num_knots mismatch"

    LC = lane_chunk                                   # samples per lane chunk
    n_chunks = pl.cdiv(B, LC)
    cpt = max(1, min(chunks_per_tile, n_chunks))      # chunks per grid step
    if n_chunks >= 2:
        # v7x: keep >= 2 grid steps so the "parallel" batch axis feeds both TCs.
        cpt = min(cpt, max(1, n_chunks // 2))
    grid_steps = pl.cdiv(n_chunks, cpt)
    n_chunks = grid_steps * cpt
    b_pad = n_chunks * LC

    # Batch-on-lanes layout: (chunk, feature, lane-of-128-samples).  Padded
    # samples (if any) are computed independently per lane and sliced off.
    xp = x if b_pad == B else jnp.pad(x, ((0, b_pad - B), (0, 0)))
    xt = xp.reshape(n_chunks, LC, input_dim).transpose(0, 2, 1)

    # Spline params as (num_bsl*N, num_knots) / (num_bsl*N, 1): each basis
    # function's control points form a (N, 1) column broadcasting over lanes.
    cp2 = cp.transpose(0, 2, 1).reshape(num_bsl * num_neurons, num_knots)
    cb2 = cb.reshape(num_bsl * num_neurons, 1)

    kernel = functools.partial(dps_kernel, knots=knots, degree=degree,
                               num_bsl=num_bsl, num_neurons=num_neurons,
                               chunks=cpt)

    def resident(shape):      # same block every grid step -> stays in VMEM
        return pl.BlockSpec(shape, lambda i: (0,) * len(shape))

    # Advisory cost hint: the elementwise spline recursion dominates, not the
    # two tiny matmuls.
    elemwise = 160 * num_bsl * num_neurons * b_pad
    mm = 2 * b_pad * num_neurons * (input_dim + out_dim)
    cost = pl.CostEstimate(flops=int(elemwise + mm),
                           transcendentals=int(num_bsl * b_pad),
                           bytes_accessed=int(4 * b_pad * (input_dim + out_dim)))

    ot = pl.pallas_call(
        kernel,
        out_shape=jax.ShapeDtypeStruct((n_chunks, out_dim, LC), jnp.float32),
        grid=(grid_steps,),
        in_specs=[
            pl.BlockSpec((cpt, input_dim, LC), lambda i: (i, 0, 0)),  # x chunks
            resident((num_neurons, input_dim)),                       # w1
            resident((num_neurons, 1)),                               # b1 column
            resident((num_bsl * num_neurons, num_knots)),             # control pts
            resident((num_bsl * num_neurons, 1)),                     # spline bias
            resident((out_dim, num_neurons)),                         # w2
            resident((out_dim, 1)),                                   # b2 column
        ],
        out_specs=pl.BlockSpec((cpt, out_dim, LC), lambda i: (i, 0, 0)),
        compiler_params=pltpu.CompilerParams(
            dimension_semantics=("parallel",),       # shard chunk groups / TCs
            vmem_limit_bytes=32 * 1024 * 1024,       # v7x-safe, ample headroom
        ),
        cost_estimate=cost,
    )(xt, w1, b1.reshape(num_neurons, 1), cp2, cb2, w2, b2.reshape(out_dim, 1))

    out = ot.transpose(0, 2, 1).reshape(b_pad, out_dim)
    return out[:B] if b_pad != B else out


# ---------------------------------------------------------------------------
# Pure-JAX reference with the original (unpruned, exact-divide) math.
# ---------------------------------------------------------------------------
def _bspline_basis_ref(xn, knots, degree):
    t = knots
    n_ext = len(t)
    basis = [jnp.where((xn >= t[i]) & (xn < t[i + 1]), 1.0, 0.0)
             for i in range(n_ext - 1)]
    for k in range(1, degree + 1):
        nxt = []
        for i in range(n_ext - 1 - k):
            term = jnp.zeros_like(xn)
            d1 = t[i + k] - t[i]
            if d1 != 0.0:
                term = term + (xn - t[i]) / d1 * basis[i]
            d2 = t[i + k + 1] - t[i + 1]
            if d2 != 0.0:
                term = term + (t[i + k + 1] - xn) / d2 * basis[i + 1]
            nxt.append(term)
        basis = nxt
    return basis


def dps_reference(x, params, *, degree, num_knots, num_bsl):
    knots = _spline_knots(degree, num_knots)
    h = x @ params["w1"].T + params["b1"]
    for blk in range(num_bsl):
        mn = jnp.min(h, axis=1, keepdims=True)
        mx = jnp.max(h, axis=1, keepdims=True)
        xn = (h - mn) / (mx - mn)
        basis = _bspline_basis_ref(xn, knots, degree)
        tout = params["cb"][blk]
        for k in range(num_knots):
            tout = tout + basis[k] * params["cp"][blk, k]
        h = tout
    return h @ params["w2"].T + params["b2"]


if __name__ == "__main__":
    # Small, forward-consistent shapes.  B=512 with 128-sample lane chunks
    # exercises both a 2-step "parallel" grid (both TCs on v7x) and the
    # in-kernel multi-chunk fori_loop path (2 chunks per grid step).
    B, input_dim = 512, 16
    degree, num_knots, num_neurons, num_bsl = 3, 12, 32, 2
    output_dim = 4

    key = jax.random.PRNGKey(0)
    ks = jax.random.split(key, 7)
    params = {
        # PyTorch layouts: Linear weight is (out_features, in_features).
        "w1": jax.random.normal(ks[0], (num_neurons, input_dim), jnp.float32)
              / np.sqrt(input_dim),
        "b1": jax.random.normal(ks[1], (num_neurons,), jnp.float32) * 0.1,
        # per-block BSL parameters: control_p (num_knots, num_neurons), bias
        "cp": jax.random.normal(ks[2], (num_bsl, num_knots, num_neurons),
                                jnp.float32),
        "cb": jax.random.normal(ks[3], (num_bsl, num_neurons), jnp.float32),
        "w2": jax.random.normal(ks[4], (output_dim, num_neurons), jnp.float32)
              / np.sqrt(num_neurons),
        "b2": jax.random.normal(ks[5], (output_dim,), jnp.float32) * 0.1,
    }
    x = jax.random.normal(ks[6], (B, input_dim), jnp.float32)

    out = dps_forward(x, params, degree=degree, num_knots=num_knots,
                      num_bsl=num_bsl)
    out = jax.block_until_ready(out)
    assert out.shape == (B, output_dim)

    ref = dps_reference(x, params, degree=degree, num_knots=num_knots,
                        num_bsl=num_bsl)
    np.testing.assert_allclose(np.asarray(out), np.asarray(ref),
                               rtol=1e-2, atol=1e-2)
    print("KERNEL_OK")
</pallas_src>

<mosaic_0001>
module attributes {stable_mosaic.version = 11 : i64} {
  func.func @dps_kernel(%arg0: i32, %arg1: memref<2x16x128xf32, #tpu.memory_space<vmem>>, %arg2: memref<32x16xf32, #tpu.memory_space<vmem>>, %arg3: memref<32x1xf32, #tpu.memory_space<vmem>>, %arg4: memref<64x12xf32, #tpu.memory_space<vmem>>, %arg5: memref<64x1xf32, #tpu.memory_space<vmem>>, %arg6: memref<4x32xf32, #tpu.memory_space<vmem>>, %arg7: memref<4x1xf32, #tpu.memory_space<vmem>>, %arg8: memref<2x4x128xf32, #tpu.memory_space<vmem>>) attributes {dimension_semantics = [#tpu.dimension_semantics<parallel>], iteration_bounds = array<i64: 2>, scalar_prefetch = 0 : i64, scratch_operands = 0 : i64, tpu.core_type = #tpu.core_type<tc>, window_params = [{transform_indices = @transform_0, window_bounds = array<i64: 2, 16, 128>}, {pipeline_mode = #tpu.pipeline_mode<synchronous>, transform_indices = @transform_1, window_bounds = array<i64: 32, 16>}, {pipeline_mode = #tpu.pipeline_mode<synchronous>, transform_indices = @transform_2, window_bounds = array<i64: 32, 1>}, {pipeline_mode = #tpu.pipeline_mode<synchronous>, transform_indices = @transform_3, window_bounds = array<i64: 64, 12>}, {pipeline_mode = #tpu.pipeline_mode<synchronous>, transform_indices = @transform_4, window_bounds = array<i64: 64, 1>}, {pipeline_mode = #tpu.pipeline_mode<synchronous>, transform_indices = @transform_5, window_bounds = array<i64: 4, 32>}, {pipeline_mode = #tpu.pipeline_mode<synchronous>, transform_indices = @transform_6, window_bounds = array<i64: 4, 1>}, {transform_indices = @transform_7, window_bounds = array<i64: 2, 4, 128>}]} {
    %c0_i32 = arith.constant 0 : i32
    %c2_i32 = arith.constant 2 : i32
    %0 = arith.addi %c0_i32, %c2_i32 : i32
    %c1_i32 = arith.constant 1 : i32
    scf.for %arg9 = %c0_i32 to %0 step %c1_i32  : i32 {
      %c0 = arith.constant 0 : index
      %c0_1 = arith.constant 0 : index
      %1 = vector.load %arg2[%c0, %c0_1] : memref<32x16xf32, #tpu.memory_space<vmem>>, vector<32x16xf32>
      %2 = arith.index_cast %arg9 : i32 to index
      %c0_2 = arith.constant 0 : index
      %c0_3 = arith.constant 0 : index
      %3 = vector.load %arg1[%2, %c0_2, %c0_3] : memref<2x16x128xf32, #tpu.memory_space<vmem>>, vector<1x16x128xf32>
      %4 = vector.shape_cast %3 : vector<1x16x128xf32> to vector<16x128xf32>
      %cst = arith.constant dense<0.000000e+00> : vector<32x128xf32>
      %5 = tpu.matmul %1, %4, %cst {dimension_numbers = #tpu.dot_dimension_numbers<[1], [0], [0], [1], [0, 0, 1, 1], [], []>} : vector<32x16xf32>, vector<16x128xf32>, vector<32x128xf32> -> vector<32x128xf32>
      %c0_4 = arith.constant 0 : index
      %c0_5 = arith.constant 0 : index
      %6 = vector.load %arg3[%c0_4, %c0_5] : memref<32x1xf32, #tpu.memory_space<vmem>>, vector<32x1xf32>
      %7 = vector.broadcast %6 : vector<32x1xf32> to vector<32x128xf32>
      %8 = arith.addf %5, %7 : vector<32x128xf32>
      %cst_6 = arith.constant dense<0x7F800000> : vector<128xf32>
      %9 = vector.multi_reduction <minimumf>, %8, %cst_6 [0] : vector<32x128xf32> to vector<128xf32>
      %10 = vector.shape_cast %9 : vector<128xf32> to vector<1x128xf32>
      %cst_7 = arith.constant dense<0xFF800000> : vector<128xf32>
      %11 = vector.multi_reduction <maximumf>, %8, %cst_7 [0] : vector<32x128xf32> to vector<128xf32>
      %12 = vector.shape_cast %11 : vector<128xf32> to vector<1x128xf32>
      %13 = arith.subf %12, %10 : vector<1x128xf32>
      %14 = tpu.reciprocal %13 {approx = true} : vector<1x128xf32> -> vector<1x128xf32>
      %15 = arith.mulf %13, %14 : vector<1x128xf32>
      %cst_8 = arith.constant 2.000000e+00 : f32
      %16 = vector.broadcast %cst_8 : f32 to vector<1x128xf32>
      %17 = arith.subf %16, %15 : vector<1x128xf32>
      %18 = arith.mulf %14, %17 : vector<1x128xf32>
      %19 = vector.broadcast %10 : vector<1x128xf32> to vector<32x128xf32>
      %20 = arith.subf %8, %19 : vector<32x128xf32>
      %21 = vector.broadcast %18 : vector<1x128xf32> to vector<32x128xf32>
      %22 = arith.mulf %20, %21 : vector<32x128xf32>
      %cst_9 = arith.constant 0.333333343 : f32
      %23 = vector.broadcast %cst_9 : f32 to vector<32x128xf32>
      %24 = arith.cmpf oge, %22, %23 : vector<32x128xf32>
      %cst_10 = arith.constant 0.000000e+00 : f32
      %cst_11 = arith.constant 1.000000e+00 : f32
      %25 = vector.broadcast %cst_10 : f32 to vector<32x128xf32>
      %26 = vector.broadcast %cst_11 : f32 to vector<32x128xf32>
      %27 = arith.select %24, %25, %26 : vector<32x128xi1>, vector<32x128xf32>
      %cst_12 = arith.constant 0.666666686 : f32
      %28 = vector.broadcast %cst_12 : f32 to vector<32x128xf32>
      %29 = arith.cmpf oge, %22, %28 : vector<32x128xf32>
      %cst_13 = arith.constant dense<true> : vector<32x128xi1>
      %30 = arith.xori %29, %cst_13 : vector<32x128xi1>
      %31 = arith.andi %24, %30 : vector<32x128xi1>
      %cst_14 = arith.constant 1.000000e+00 : f32
      %cst_15 = arith.constant 0.000000e+00 : f32
      %32 = vector.broadcast %cst_14 : f32 to vector<32x128xf32>
      %33 = vector.broadcast %cst_15 : f32 to vector<32x128xf32>
      %34 = arith.select %31, %32, %33 : vector<32x128xi1>, vector<32x128xf32>
      %cst_16 = arith.constant 1.000000e+00 : f32
      %35 = vector.broadcast %cst_16 : f32 to vector<32x128xf32>
      %36 = arith.cmpf oge, %22, %35 : vector<32x128xf32>
      %cst_17 = arith.constant dense<true> : vector<32x128xi1>
      %37 = arith.xori %36, %cst_17 : vector<32x128xi1>
      %38 = arith.andi %29, %37 : vector<32x128xi1>
      %cst_18 = arith.constant 1.000000e+00 : f32
      %cst_19 = arith.constant 0.000000e+00 : f32
      %39 = vector.broadcast %cst_18 : f32 to vector<32x128xf32>
      %40 = vector.broadcast %cst_19 : f32 to vector<32x128xf32>
      %41 = arith.select %38, %39, %40 : vector<32x128xi1>, vector<32x128xf32>
      %cst_20 = arith.constant 1.000000e+00 : f32
      %cst_21 = arith.constant 0.000000e+00 : f32
      %42 = vector.broadcast %cst_20 : f32 to vector<32x128xf32>
      %43 = vector.broadcast %cst_21 : f32 to vector<32x128xf32>
      %44 = arith.select %36, %42, %43 : vector<32x128xi1>, vector<32x128xf32>
      %cst_22 = arith.constant 0.333333343 : f32
      %45 = vector.broadcast %cst_22 : f32 to vector<32x128xf32>
      %46 = arith.subf %22, %45 : vector<32x128xf32>
      %cst_23 = arith.constant -3.000000e+00 : f32
      %47 = vector.broadcast %cst_23 : f32 to vector<32x128xf32>
      %48 = arith.mulf %46, %47 : vector<32x128xf32>
      %49 = arith.mulf %48, %27 : vector<32x128xf32>
      %cst_24 = arith.constant 0.000000e+00 : f32
      %50 = vector.broadcast %cst_24 : f32 to vector<32x128xf32>
      %51 = arith.subf %22, %50 : vector<32x128xf32>
      %cst_25 = arith.constant 3.000000e+00 : f32
      %52 = vector.broadcast %cst_25 : f32 to vector<32x128xf32>
      %53 = arith.mulf %51, %52 : vector<32x128xf32>
      %54 = arith.mulf %53, %27 : vector<32x128xf32>
      %cst_26 = arith.constant 0.666666686 : f32
      %55 = vector.broadcast %cst_26 : f32 to vector<32x128xf32>
      %56 = arith.subf %22, %55 : vector<32x128xf32>
      %cst_27 = arith.constant -3.000000e+00 : f32
      %57 = vector.broadcast %cst_27 : f32 to vector<32x128xf32>
      %58 = arith.mulf %56, %57 : vector<32x128xf32>
      %59 = arith.mulf %58, %34 : vector<32x128xf32>
      %60 = arith.addf %54, %59 : vector<32x128xf32>
      %cst_28 = arith.constant 3.000000e+00 : f32
      %61 = vector.broadcast %cst_28 : f32 to vector<32x128xf32>
      %62 = arith.mulf %46, %61 : vector<32x128xf32>
      %63 = arith.mulf %62, %34 : vector<32x128xf32>
      %cst_29 = arith.constant 1.000000e+00 : f32
      %64 = vector.broadcast %cst_29 : f32 to vector<32x128xf32>
      %65 = arith.subf %22, %64 : vector<32x128xf32>
      %cst_30 = arith.constant -3.000000e+00 : f32
      %66 = vector.broadcast %cst_30 : f32 to vector<32x128xf32>
      %67 = arith.mulf %65, %66 : vector<32x128xf32>
      %68 = arith.mulf %67, %41 : vector<32x128xf32>
      %69 = arith.addf %63, %68 : vector<32x128xf32>
      %cst_31 = arith.constant 3.000000e+00 : f32
      %70 = vector.broadcast %cst_31 : f32 to vector<32x128xf32>
      %71 = arith.mulf %56, %70 : vector<32x128xf32>
      %72 = arith.mulf %71, %41 : vector<32x128xf32>
      %cst_32 = arith.constant 1.001000e+00 : f32
      %73 = vector.broadcast %cst_32 : f32 to vector<32x128xf32>
      %74 = arith.subf %22, %73 : vector<32x128xf32>
      %cst_33 = arith.constant -1.000000e+03 : f32
      %75 = vector.broadcast %cst_33 : f32 to vector<32x128xf32>
      %76 = arith.mulf %74, %75 : vector<32x128xf32>
      %77 = arith.mulf %76, %44 : vector<32x128xf32>
      %78 = arith.addf %72, %77 : vector<32x128xf32>
      %cst_34 = arith.constant 1.000000e+03 : f32
      %79 = vector.broadcast %cst_34 : f32 to vector<32x128xf32>
      %80 = arith.mulf %65, %79 : vector<32x128xf32>
      %81 = arith.mulf %80, %44 : vector<32x128xf32>
      %cst_35 = arith.constant -2.99102688 : f32
      %82 = vector.broadcast %cst_35 : f32 to vector<32x128xf32>
      %83 = arith.mulf %46, %82 : vector<32x128xf32>
      %84 = arith.mulf %83, %49 : vector<32x128xf32>
      %cst_36 = arith.constant -1.000000e-03 : f32
      %85 = vector.broadcast %cst_36 : f32 to vector<32x128xf32>
      %86 = arith.subf %22, %85 : vector<32x128xf32>
      %cst_37 = arith.constant 2.99102688 : f32
      %87 = vector.broadcast %cst_37 : f32 to vector<32x128xf32>
      %88 = arith.mulf %86, %87 : vector<32x128xf32>
      %89 = arith.mulf %88, %49 : vector<32x128xf32>
      %cst_38 = arith.constant -1.500000e+00 : f32
      %90 = vector.broadcast %cst_38 : f32 to vector<32x128xf32>
      %91 = arith.mulf %56, %90 : vector<32x128xf32>
      %92 = arith.mulf %91, %60 : vector<32x128xf32>
      %93 = arith.addf %89, %92 : vector<32x128xf32>
      %cst_39 = arith.constant 1.500000e+00 : f32
      %94 = vector.broadcast %cst_39 : f32 to vector<32x128xf32>
      %95 = arith.mulf %51, %94 : vector<32x128xf32>
      %96 = arith.mulf %95, %60 : vector<32x128xf32>
      %cst_40 = arith.constant -1.500000e+00 : f32
      %97 = vector.broadcast %cst_40 : f32 to vector<32x128xf32>
      %98 = arith.mulf %65, %97 : vector<32x128xf32>
      %99 = arith.mulf %98, %69 : vector<32x128xf32>
      %100 = arith.addf %96, %99 : vector<32x128xf32>
      %cst_41 = arith.constant 1.500000e+00 : f32
      %101 = vector.broadcast %cst_41 : f32 to vector<32x128xf32>
      %102 = arith.mulf %46, %101 : vector<32x128xf32>
      %103 = arith.mulf %102, %69 : vector<32x128xf32>
      %cst_42 = arith.constant -2.99102688 : f32
      %104 = vector.broadcast %cst_42 : f32 to vector<32x128xf32>
      %105 = arith.mulf %74, %104 : vector<32x128xf32>
      %106 = arith.mulf %105, %78 : vector<32x128xf32>
      %107 = arith.addf %103, %106 : vector<32x128xf32>
      %cst_43 = arith.constant 2.99102688 : f32
      %108 = vector.broadcast %cst_43 : f32 to vector<32x128xf32>
      %109 = arith.mulf %56, %108 : vector<32x128xf32>
      %110 = arith.mulf %109, %78 : vector<32x128xf32>
      %cst_44 = arith.constant 1.001500e+00 : f32
      %111 = vector.broadcast %cst_44 : f32 to vector<32x128xf32>
      %112 = arith.subf %22, %111 : vector<32x128xf32>
      %cst_45 = arith.constant -666.666687 : f32
      %113 = vector.broadcast %cst_45 : f32 to vector<32x128xf32>
      %114 = arith.mulf %112, %113 : vector<32x128xf32>
      %115 = arith.mulf %114, %81 : vector<32x128xf32>
      %116 = arith.addf %110, %115 : vector<32x128xf32>
      %cst_46 = arith.constant 666.666687 : f32
      %117 = vector.broadcast %cst_46 : f32 to vector<32x128xf32>
      %118 = arith.mulf %65, %117 : vector<32x128xf32>
      %119 = arith.mulf %118, %81 : vector<32x128xf32>
      %cst_47 = arith.constant -2.98656058 : f32
      %120 = vector.broadcast %cst_47 : f32 to vector<32x128xf32>
      %121 = arith.mulf %46, %120 : vector<32x128xf32>
      %122 = arith.mulf %121, %84 : vector<32x128xf32>
      %c0_48 = arith.constant 0 : index
      %c3 = arith.constant 3 : index
      %123 = vector.load %arg4[%c0_48, %c3] : memref<64x12xf32, #tpu.memory_space<vmem>>, vector<32x1xf32>
      %124 = vector.broadcast %123 : vector<32x1xf32> to vector<32x128xf32>
      %125 = arith.mulf %122, %124 : vector<32x128xf32>
      %cst_49 = arith.constant -1.500000e-03 : f32
      %126 = vector.broadcast %cst_49 : f32 to vector<32x128xf32>
      %127 = arith.subf %22, %126 : vector<32x128xf32>
      %cst_50 = arith.constant 2.98656058 : f32
      %128 = vector.broadcast %cst_50 : f32 to vector<32x128xf32>
      %129 = arith.mulf %127, %128 : vector<32x128xf32>
      %130 = arith.mulf %129, %84 : vector<32x128xf32>
      %cst_51 = arith.constant -1.49775338 : f32
      %131 = vector.broadcast %cst_51 : f32 to vector<32x128xf32>
      %132 = arith.mulf %56, %131 : vector<32x128xf32>
      %133 = arith.mulf %132, %93 : vector<32x128xf32>
      %134 = arith.addf %130, %133 : vector<32x128xf32>
      %c0_52 = arith.constant 0 : index
      %c4 = arith.constant 4 : index
      %135 = vector.load %arg4[%c0_52, %c4] : memref<64x12xf32, #tpu.memory_space<vmem>>, vector<32x1xf32>
      %136 = vector.broadcast %135 : vector<32x1xf32> to vector<32x128xf32>
      %137 = arith.mulf %134, %136 : vector<32x128xf32>
      %cst_53 = arith.constant 1.49775338 : f32
      %138 = vector.broadcast %cst_53 : f32 to vector<32x128xf32>
      %139 = arith.mulf %86, %138 : vector<32x128xf32>
      %140 = arith.mulf %139, %93 : vector<32x128xf32>
      %cst_54 = arith.constant -1.000000e+00 : f32
      %141 = vector.broadcast %cst_54 : f32 to vector<32x128xf32>
      %142 = arith.mulf %65, %141 : vector<32x128xf32>
      %143 = arith.mulf %142, %100 : vector<32x128xf32>
      %144 = arith.addf %140, %143 : vector<32x128xf32>
      %c0_55 = arith.constant 0 : index
      %c5 = arith.constant 5 : index
      %145 = vector.load %arg4[%c0_55, %c5] : memref<64x12xf32, #tpu.memory_space<vmem>>, vector<32x1xf32>
      %146 = vector.broadcast %145 : vector<32x1xf32> to vector<32x128xf32>
      %147 = arith.mulf %144, %146 : vector<32x128xf32>
      %cst_56 = arith.constant 1.000000e+00 : f32
      %148 = vector.broadcast %cst_56 : f32 to vector<32x128xf32>
      %149 = arith.mulf %51, %148 : vector<32x128xf32>
      %150 = arith.mulf %149, %100 : vector<32x128xf32>
      %cst_57 = arith.constant -1.49775338 : f32
      %151 = vector.broadcast %cst_57 : f32 to vector<32x128xf32>
      %152 = arith.mulf %74, %151 : vector<32x128xf32>
      %153 = arith.mulf %152, %107 : vector<32x128xf32>
      %154 = arith.addf %150, %153 : vector<32x128xf32>
      %c0_58 = arith.constant 0 : index
      %c6 = arith.constant 6 : index
      %155 = vector.load %arg4[%c0_58, %c6] : memref<64x12xf32, #tpu.memory_space<vmem>>, vector<32x1xf32>
      %156 = vector.broadcast %155 : vector<32x1xf32> to vector<32x128xf32>
      %157 = arith.mulf %154, %156 : vector<32x128xf32>
      %cst_59 = arith.constant 1.49775338 : f32
      %158 = vector.broadcast %cst_59 : f32 to vector<32x128xf32>
      %159 = arith.mulf %46, %158 : vector<32x128xf32>
      %160 = arith.mulf %159, %107 : vector<32x128xf32>
      %cst_60 = arith.constant -2.98656058 : f32
      %161 = vector.broadcast %cst_60 : f32 to vector<32x128xf32>
      %162 = arith.mulf %112, %161 : vector<32x128xf32>
      %163 = arith.mulf %162, %116 : vector<32x128xf32>
      %164 = arith.addf %160, %163 : vector<32x128xf32>
      %c0_61 = arith.constant 0 : index
      %c7 = arith.constant 7 : index
      %165 = vector.load %arg4[%c0_61, %c7] : memref<64x12xf32, #tpu.memory_space<vmem>>, vector<32x1xf32>
      %166 = vector.broadcast %165 : vector<32x1xf32> to vector<32x128xf32>
      %167 = arith.mulf %164, %166 : vector<32x128xf32>
      %168 = arith.addf %125, %167 : vector<32x128xf32>
      %cst_62 = arith.constant 2.98656058 : f32
      %169 = vector.broadcast %cst_62 : f32 to vector<32x128xf32>
      %170 = arith.mulf %56, %169 : vector<32x128xf32>
      %171 = arith.mulf %170, %116 : vector<32x128xf32>
      %cst_63 = arith.constant 1.002000e+00 : f32
      %172 = vector.broadcast %cst_63 : f32 to vector<32x128xf32>
      %173 = arith.subf %22, %172 : vector<32x128xf32>
      %cst_64 = arith.constant -5.000000e+02 : f32
      %174 = vector.broadcast %cst_64 : f32 to vector<32x128xf32>
      %175 = arith.mulf %173, %174 : vector<32x128xf32>
      %176 = arith.mulf %175, %119 : vector<32x128xf32>
      %177 = arith.addf %171, %176 : vector<32x128xf32>
      %c0_65 = arith.constant 0 : index
      %c8 = arith.constant 8 : index
      %178 = vector.load %arg4[%c0_65, %c8] : memref<64x12xf32, #tpu.memory_space<vmem>>, vector<32x1xf32>
      %179 = vector.broadcast %178 : vector<32x1xf32> to vector<32x128xf32>
      %180 = arith.mulf %177, %179 : vector<32x128xf32>
      %181 = arith.addf %137, %180 : vector<32x128xf32>
      %cst_66 = arith.constant 5.000000e+02 : f32
      %182 = vector.broadcast %cst_66 : f32 to vector<32x128xf32>
      %183 = arith.mulf %65, %182 : vector<32x128xf32>
      %184 = arith.mulf %183, %119 : vector<32x128xf32>
      %c0_67 = arith.constant 0 : index
      %c9 = arith.constant 9 : index
      %185 = vector.load %arg4[%c0_67, %c9] : memref<64x12xf32, #tpu.memory_space<vmem>>, vector<32x1xf32>
      %186 = vector.broadcast %185 : vector<32x1xf32> to vector<32x128xf32>
      %187 = arith.mulf %184, %186 : vector<32x128xf32>
      %188 = arith.addf %147, %187 : vector<32x128xf32>
      %c0_68 = arith.constant 0 : index
      %c0_69 = arith.constant 0 : index
      %189 = vector.load %arg5[%c0_68, %c0_69] : memref<64x1xf32, #tpu.memory_space<vmem>>, vector<32x1xf32>
      %190 = arith.addf %168, %181 : vector<32x128xf32>
      %191 = arith.addf %188, %157 : vector<32x128xf32>
      %192 = arith.addf %190, %191 : vector<32x128xf32>
      %193 = vector.broadcast %189 : vector<32x1xf32> to vector<32x128xf32>
      %194 = arith.addf %192, %193 : vector<32x128xf32>
      %cst_70 = arith.constant dense<0x7F800000> : vector<128xf32>
      %195 = vector.multi_reduction <minimumf>, %194, %cst_70 [0] : vector<32x128xf32> to vector<128xf32>
      %196 = vector.shape_cast %195 : vector<128xf32> to vector<1x128xf32>
      %cst_71 = arith.constant dense<0xFF800000> : vector<128xf32>
      %197 = vector.multi_reduction <maximumf>, %194, %cst_71 [0] : vector<32x128xf32> to vector<128xf32>
      %198 = vector.shape_cast %197 : vector<128xf32> to vector<1x128xf32>
      %199 = arith.subf %198, %196 : vector<1x128xf32>
      %200 = tpu.reciprocal %199 {approx = true} : vector<1x128xf32> -> vector<1x128xf32>
      %201 = arith.mulf %199, %200 : vector<1x128xf32>
      %cst_72 = arith.constant 2.000000e+00 : f32
      %202 = vector.broadcast %cst_72 : f32 to vector<1x128xf32>
      %203 = arith.subf %202, %201 : vector<1x128xf32>
      %204 = arith.mulf %200, %203 : vector<1x128xf32>
      %205 = vector.broadcast %196 : vector<1x128xf32> to vector<32x128xf32>
      %206 = arith.subf %194, %205 : vector<32x128xf32>
      %207 = vector.broadcast %204 : vector<1x128xf32> to vector<32x128xf32>
      %208 = arith.mulf %206, %207 : vector<32x128xf32>
      %cst_73 = arith.constant 0.333333343 : f32
      %209 = vector.broadcast %cst_73 : f32 to vector<32x128xf32>
      %210 = arith.cmpf oge, %208, %209 : vector<32x128xf32>
      %cst_74 = arith.constant 0.000000e+00 : f32
      %cst_75 = arith.constant 1.000000e+00 : f32
      %211 = vector.broadcast %cst_74 : f32 to vector<32x128xf32>
      %212 = vector.broadcast %cst_75 : f32 to vector<32x128xf32>
      %213 = arith.select %210, %211, %212 : vector<32x128xi1>, vector<32x128xf32>
      %cst_76 = arith.constant 0.666666686 : f32
      %214 = vector.broadcast %cst_76 : f32 to vector<32x128xf32>
      %215 = arith.cmpf oge, %208, %214 : vector<32x128xf32>
      %cst_77 = arith.constant dense<true> : vector<32x128xi1>
      %216 = arith.xori %215, %cst_77 : vector<32x128xi1>
      %217 = arith.andi %210, %216 : vector<32x128xi1>
      %cst_78 = arith.constant 1.000000e+00 : f32
      %cst_79 = arith.constant 0.000000e+00 : f32
      %218 = vector.broadcast %cst_78 : f32 to vector<32x128xf32>
      %219 = vector.broadcast %cst_79 : f32 to vector<32x128xf32>
      %220 = arith.select %217, %218, %219 : vector<32x128xi1>, vector<32x128xf32>
      %cst_80 = arith.constant 1.000000e+00 : f32
      %221 = vector.broadcast %cst_80 : f32 to vector<32x128xf32>
      %222 = arith.cmpf oge, %208, %221 : vector<32x128xf32>
      %cst_81 = arith.constant dense<true> : vector<32x128xi1>
      %223 = arith.xori %222, %cst_81 : vector<32x128xi1>
      %224 = arith.andi %215, %223 : vector<32x128xi1>
      %cst_82 = arith.constant 1.000000e+00 : f32
      %cst_83 = arith.constant 0.000000e+00 : f32
      %225 = vector.broadcast %cst_82 : f32 to vector<32x128xf32>
      %226 = vector.broadcast %cst_83 : f32 to vector<32x128xf32>
      %227 = arith.select %224, %225, %226 : vector<32x128xi1>, vector<32x128xf32>
      %cst_84 = arith.constant 1.000000e+00 : f32
      %cst_85 = arith.constant 0.000000e+00 : f32
      %228 = vector.broadcast %cst_84 : f32 to vector<32x128xf32>
      %229 = vector.broadcast %cst_85 : f32 to vector<32x128xf32>
      %230 = arith.select %222, %228, %229 : vector<32x128xi1>, vector<32x128xf32>
      %cst_86 = arith.constant 0.333333343 : f32
      %231 = vector.broadcast %cst_86 : f32 to vector<32x128xf32>
      %232 = arith.subf %208, %231 : vector<32x128xf32>
      %cst_87 = arith.constant -3.000000e+00 : f32
      %233 = vector.broadcast %cst_87 : f32 to vector<32x128xf32>
      %234 = arith.mulf %232, %233 : vector<32x128xf32>
      %235 = arith.mulf %234, %213 : vector<32x128xf32>
      %cst_88 = arith.constant 0.000000e+00 : f32
      %236 = vector.broadcast %cst_88 : f32 to vector<32x128xf32>
      %237 = arith.subf %208, %236 : vector<32x128xf32>
      %cst_89 = arith.constant 3.000000e+00 : f32
      %238 = vector.broadcast %cst_89 : f32 to vector<32x128xf32>
      %239 = arith.mulf %237, %238 : vector<32x128xf32>
      %240 = arith.mulf %239, %213 : vector<32x128xf32>
      %cst_90 = arith.constant 0.666666686 : f32
      %241 = vector.broadcast %cst_90 : f32 to vector<32x128xf32>
      %242 = arith.subf %208, %241 : vector<32x128xf32>
      %cst_91 = arith.constant -3.000000e+00 : f32
      %243 = vector.broadcast %cst_91 : f32 to vector<32x128xf32>
      %244 = arith.mulf %242, %243 : vector<32x128xf32>
      %245 = arith.mulf %244, %220 : vector<32x128xf32>
      %246 = arith.addf %240, %245 : vector<32x128xf32>
      %cst_92 = arith.constant 3.000000e+00 : f32
      %247 = vector.broadcast %cst_92 : f32 to vector<32x128xf32>
      %248 = arith.mulf %232, %247 : vector<32x128xf32>
      %249 = arith.mulf %248, %220 : vector<32x128xf32>
      %cst_93 = arith.constant 1.000000e+00 : f32
      %250 = vector.broadcast %cst_93 : f32 to vector<32x128xf32>
      %251 = arith.subf %208, %250 : vector<32x128xf32>
      %cst_94 = arith.constant -3.000000e+00 : f32
      %252 = vector.broadcast %cst_94 : f32 to vector<32x128xf32>
      %253 = arith.mulf %251, %252 : vector<32x128xf32>
      %254 = arith.mulf %253, %227 : vector<32x128xf32>
      %255 = arith.addf %249, %254 : vector<32x128xf32>
      %cst_95 = arith.constant 3.000000e+00 : f32
      %256 = vector.broadcast %cst_95 : f32 to vector<32x128xf32>
      %257 = arith.mulf %242, %256 : vector<32x128xf32>
      %258 = arith.mulf %257, %227 : vector<32x128xf32>
      %cst_96 = arith.constant 1.001000e+00 : f32
      %259 = vector.broadcast %cst_96 : f32 to vector<32x128xf32>
      %260 = arith.subf %208, %259 : vector<32x128xf32>
      %cst_97 = arith.constant -1.000000e+03 : f32
      %261 = vector.broadcast %cst_97 : f32 to vector<32x128xf32>
      %262 = arith.mulf %260, %261 : vector<32x128xf32>
      %263 = arith.mulf %262, %230 : vector<32x128xf32>
      %264 = arith.addf %258, %263 : vector<32x128xf32>
      %cst_98 = arith.constant 1.000000e+03 : f32
      %265 = vector.broadcast %cst_98 : f32 to vector<32x128xf32>
      %266 = arith.mulf %251, %265 : vector<32x128xf32>
      %267 = arith.mulf %266, %230 : vector<32x128xf32>
      %cst_99 = arith.constant -2.99102688 : f32
      %268 = vector.broadcast %cst_99 : f32 to vector<32x128xf32>
      %269 = arith.mulf %232, %268 : vector<32x128xf32>
      %270 = arith.mulf %269, %235 : vector<32x128xf32>
      %cst_100 = arith.constant -1.000000e-03 : f32
      %271 = vector.broadcast %cst_100 : f32 to vector<32x128xf32>
      %272 = arith.subf %208, %271 : vector<32x128xf32>
      %cst_101 = arith.constant 2.99102688 : f32
      %273 = vector.broadcast %cst_101 : f32 to vector<32x128xf32>
      %274 = arith.mulf %272, %273 : vector<32x128xf32>
      %275 = arith.mulf %274, %235 : vector<32x128xf32>
      %cst_102 = arith.constant -1.500000e+00 : f32
      %276 = vector.broadcast %cst_102 : f32 to vector<32x128xf32>
      %277 = arith.mulf %242, %276 : vector<32x128xf32>
      %278 = arith.mulf %277, %246 : vector<32x128xf32>
      %279 = arith.addf %275, %278 : vector<32x128xf32>
      %cst_103 = arith.constant 1.500000e+00 : f32
      %280 = vector.broadcast %cst_103 : f32 to vector<32x128xf32>
      %281 = arith.mulf %237, %280 : vector<32x128xf32>
      %282 = arith.mulf %281, %246 : vector<32x128xf32>
      %cst_104 = arith.constant -1.500000e+00 : f32
      %283 = vector.broadcast %cst_104 : f32 to vector<32x128xf32>
      %284 = arith.mulf %251, %283 : vector<32x128xf32>
      %285 = arith.mulf %284, %255 : vector<32x128xf32>
      %286 = arith.addf %282, %285 : vector<32x128xf32>
      %cst_105 = arith.constant 1.500000e+00 : f32
      %287 = vector.broadcast %cst_105 : f32 to vector<32x128xf32>
      %288 = arith.mulf %232, %287 : vector<32x128xf32>
      %289 = arith.mulf %288, %255 : vector<32x128xf32>
      %cst_106 = arith.constant -2.99102688 : f32
      %290 = vector.broadcast %cst_106 : f32 to vector<32x128xf32>
      %291 = arith.mulf %260, %290 : vector<32x128xf32>
      %292 = arith.mulf %291, %264 : vector<32x128xf32>
      %293 = arith.addf %289, %292 : vector<32x128xf32>
      %cst_107 = arith.constant 2.99102688 : f32
      %294 = vector.broadcast %cst_107 : f32 to vector<32x128xf32>
      %295 = arith.mulf %242, %294 : vector<32x128xf32>
      %296 = arith.mulf %295, %264 : vector<32x128xf32>
      %cst_108 = arith.constant 1.001500e+00 : f32
      %297 = vector.broadcast %cst_108 : f32 to vector<32x128xf32>
      %298 = arith.subf %208, %297 : vector<32x128xf32>
      %cst_109 = arith.constant -666.666687 : f32
      %299 = vector.broadcast %cst_109 : f32 to vector<32x128xf32>
      %300 = arith.mulf %298, %299 : vector<32x128xf32>
      %301 = arith.mulf %300, %267 : vector<32x128xf32>
      %302 = arith.addf %296, %301 : vector<32x128xf32>
      %cst_110 = arith.constant 666.666687 : f32
      %303 = vector.broadcast %cst_110 : f32 to vector<32x128xf32>
      %304 = arith.mulf %251, %303 : vector<32x128xf32>
      %305 = arith.mulf %304, %267 : vector<32x128xf32>
      %cst_111 = arith.constant -2.98656058 : f32
      %306 = vector.broadcast %cst_111 : f32 to vector<32x128xf32>
      %307 = arith.mulf %232, %306 : vector<32x128xf32>
      %308 = arith.mulf %307, %270 : vector<32x128xf32>
      %c32 = arith.constant 32 : index
      %c3_112 = arith.constant 3 : index
      %309 = vector.load %arg4[%c32, %c3_112] : memref<64x12xf32, #tpu.memory_space<vmem>>, vector<32x1xf32>
      %310 = vector.broadcast %309 : vector<32x1xf32> to vector<32x128xf32>
      %311 = arith.mulf %308, %310 : vector<32x128xf32>
      %cst_113 = arith.constant -1.500000e-03 : f32
      %312 = vector.broadcast %cst_113 : f32 to vector<32x128xf32>
      %313 = arith.subf %208, %312 : vector<32x128xf32>
      %cst_114 = arith.constant 2.98656058 : f32
      %314 = vector.broadcast %cst_114 : f32 to vector<32x128xf32>
      %315 = arith.mulf %313, %314 : vector<32x128xf32>
      %316 = arith.mulf %315, %270 : vector<32x128xf32>
      %cst_115 = arith.constant -1.49775338 : f32
      %317 = vector.broadcast %cst_115 : f32 to vector<32x128xf32>
      %318 = arith.mulf %242, %317 : vector<32x128xf32>
      %319 = arith.mulf %318, %279 : vector<32x128xf32>
      %320 = arith.addf %316, %319 : vector<32x128xf32>
      %c32_116 = arith.constant 32 : index
      %c4_117 = arith.constant 4 : index
      %321 = vector.load %arg4[%c32_116, %c4_117] : memref<64x12xf32, #tpu.memory_space<vmem>>, vector<32x1xf32>
      %322 = vector.broadcast %321 : vector<32x1xf32> to vector<32x128xf32>
      %323 = arith.mulf %320, %322 : vector<32x128xf32>
      %cst_118 = arith.constant 1.49775338 : f32
      %324 = vector.broadcast %cst_118 : f32 to vector<32x128xf32>
      %325 = arith.mulf %272, %324 : vector<32x128xf32>
      %326 = arith.mulf %325, %279 : vector<32x128xf32>
      %cst_119 = arith.constant -1.000000e+00 : f32
      %327 = vector.broadcast %cst_119 : f32 to vector<32x128xf32>
      %328 = arith.mulf %251, %327 : vector<32x128xf32>
      %329 = arith.mulf %328, %286 : vector<32x128xf32>
      %330 = arith.addf %326, %329 : vector<32x128xf32>
      %c32_120 = arith.constant 32 : index
      %c5_121 = arith.constant 5 : index
      %331 = vector.load %arg4[%c32_120, %c5_121] : memref<64x12xf32, #tpu.memory_space<vmem>>, vector<32x1xf32>
      %332 = vector.broadcast %331 : vector<32x1xf32> to vector<32x128xf32>
      %333 = arith.mulf %330, %332 : vector<32x128xf32>
      %cst_122 = arith.constant 1.000000e+00 : f32
      %334 = vector.broadcast %cst_122 : f32 to vector<32x128xf32>
      %335 = arith.mulf %237, %334 : vector<32x128xf32>
      %336 = arith.mulf %335, %286 : vector<32x128xf32>
      %cst_123 = arith.constant -1.49775338 : f32
      %337 = vector.broadcast %cst_123 : f32 to vector<32x128xf32>
      %338 = arith.mulf %260, %337 : vector<32x128xf32>
      %339 = arith.mulf %338, %293 : vector<32x128xf32>
      %340 = arith.addf %336, %339 : vector<32x128xf32>
      %c32_124 = arith.constant 32 : index
      %c6_125 = arith.constant 6 : index
      %341 = vector.load %arg4[%c32_124, %c6_125] : memref<64x12xf32, #tpu.memory_space<vmem>>, vector<32x1xf32>
      %342 = vector.broadcast %341 : vector<32x1xf32> to vector<32x128xf32>
      %343 = arith.mulf %340, %342 : vector<32x128xf32>
      %cst_126 = arith.constant 1.49775338 : f32
      %344 = vector.broadcast %cst_126 : f32 to vector<32x128xf32>
      %345 = arith.mulf %232, %344 : vector<32x128xf32>
      %346 = arith.mulf %345, %293 : vector<32x128xf32>
      %cst_127 = arith.constant -2.98656058 : f32
      %347 = vector.broadcast %cst_127 : f32 to vector<32x128xf32>
      %348 = arith.mulf %298, %347 : vector<32x128xf32>
      %349 = arith.mulf %348, %302 : vector<32x128xf32>
      %350 = arith.addf %346, %349 : vector<32x128xf32>
      %c32_128 = arith.constant 32 : index
      %c7_129 = arith.constant 7 : index
      %351 = vector.load %arg4[%c32_128, %c7_129] : memref<64x12xf32, #tpu.memory_space<vmem>>, vector<32x1xf32>
      %352 = vector.broadcast %351 : vector<32x1xf32> to vector<32x128xf32>
      %353 = arith.mulf %350, %352 : vector<32x128xf32>
      %354 = arith.addf %311, %353 : vector<32x128xf32>
      %cst_130 = arith.constant 2.98656058 : f32
      %355 = vector.broadcast %cst_130 : f32 to vector<32x128xf32>
      %356 = arith.mulf %242, %355 : vector<32x128xf32>
      %357 = arith.mulf %356, %302 : vector<32x128xf32>
      %cst_131 = arith.constant 1.002000e+00 : f32
      %358 = vector.broadcast %cst_131 : f32 to vector<32x128xf32>
      %359 = arith.subf %208, %358 : vector<32x128xf32>
      %cst_132 = arith.constant -5.000000e+02 : f32
      %360 = vector.broadcast %cst_132 : f32 to vector<32x128xf32>
      %361 = arith.mulf %359, %360 : vector<32x128xf32>
      %362 = arith.mulf %361, %305 : vector<32x128xf32>
      %363 = arith.addf %357, %362 : vector<32x128xf32>
      %c32_133 = arith.constant 32 : index
      %c8_134 = arith.constant 8 : index
      %364 = vector.load %arg4[%c32_133, %c8_134] : memref<64x12xf32, #tpu.memory_space<vmem>>, vector<32x1xf32>
      %365 = vector.broadcast %364 : vector<32x1xf32> to vector<32x128xf32>
      %366 = arith.mulf %363, %365 : vector<32x128xf32>
      %367 = arith.addf %323, %366 : vector<32x128xf32>
      %cst_135 = arith.constant 5.000000e+02 : f32
      %368 = vector.broadcast %cst_135 : f32 to vector<32x128xf32>
      %369 = arith.mulf %251, %368 : vector<32x128xf32>
      %370 = arith.mulf %369, %305 : vector<32x128xf32>
      %c32_136 = arith.constant 32 : index
      %c9_137 = arith.constant 9 : index
      %371 = vector.load %arg4[%c32_136, %c9_137] : memref<64x12xf32, #tpu.memory_space<vmem>>, vector<32x1xf32>
      %372 = vector.broadcast %371 : vector<32x1xf32> to vector<32x128xf32>
      %373 = arith.mulf %370, %372 : vector<32x128xf32>
      %374 = arith.addf %333, %373 : vector<32x128xf32>
      %c32_138 = arith.constant 32 : index
      %c0_139 = arith.constant 0 : index
      %375 = vector.load %arg5[%c32_138, %c0_139] : memref<64x1xf32, #tpu.memory_space<vmem>>, vector<32x1xf32>
      %376 = arith.addf %354, %367 : vector<32x128xf32>
      %377 = arith.addf %374, %343 : vector<32x128xf32>
      %378 = arith.addf %376, %377 : vector<32x128xf32>
      %379 = vector.broadcast %375 : vector<32x1xf32> to vector<32x128xf32>
      %380 = arith.addf %378, %379 : vector<32x128xf32>
      %c0_140 = arith.constant 0 : index
      %c0_141 = arith.constant 0 : index
      %381 = vector.load %arg6[%c0_140, %c0_141] : memref<4x32xf32, #tpu.memory_space<vmem>>, vector<4x32xf32>
      %cst_142 = arith.constant dense<0.000000e+00> : vector<4x128xf32>
      %382 = tpu.matmul %381, %380, %cst_142 {dimension_numbers = #tpu.dot_dimension_numbers<[1], [0], [0], [1], [0, 0, 1, 1], [], []>} : vector<4x32xf32>, vector<32x128xf32>, vector<4x128xf32> -> vector<4x128xf32>
      %c0_143 = arith.constant 0 : index
      %c0_144 = arith.constant 0 : index
      %383 = vector.load %arg7[%c0_143, %c0_144] : memref<4x1xf32, #tpu.memory_space<vmem>>, vector<4x1xf32>
      %384 = vector.broadcast %383 : vector<4x1xf32> to vector<4x128xf32>
      %385 = arith.addf %382, %384 : vector<4x128xf32>
      %386 = arith.index_cast %arg9 : i32 to index
      %c0_145 = arith.constant 0 : index
      %c0_146 = arith.constant 0 : index
      %387 = vector.load %arg8[%386, %c0_145, %c0_146] : memref<2x4x128xf32, #tpu.memory_space<vmem>>, vector<1x4x128xf32>
      %388 = vector.shape_cast %387 : vector<1x4x128xf32> to vector<4x128xf32>
      %389 = vector.shape_cast %385 : vector<4x128xf32> to vector<1x4x128xf32>
      tpu.vector_store %arg8[%386, %c0_145, %c0_146], %389 {strides = array<i32>} : memref<2x4x128xf32, #tpu.memory_space<vmem>>, vector<1x4x128xf32>,
    }
    %c2_i32_0 = arith.constant 2 : i32
    return
  }
  func.func @transform_0(%arg0: i32) -> (i32, i32, i32) {
    %c0_i32 = arith.constant 0 : i32
    %c0_i32_0 = arith.constant 0 : i32
    %c0_i32_1 = arith.constant 0 : i32
    return %arg0, %c0_i32, %c0_i32_0 : i32, i32, i32
  }
  func.func @transform_1(%arg0: i32) -> (i32, i32) {
    %c0_i32 = arith.constant 0 : i32
    %c0_i32_0 = arith.constant 0 : i32
    %c0_i32_1 = arith.constant 0 : i32
    return %c0_i32, %c0_i32_0 : i32, i32
  }
  func.func @transform_2(%arg0: i32) -> (i32, i32) {
    %c0_i32 = arith.constant 0 : i32
    %c0_i32_0 = arith.constant 0 : i32
    %c0_i32_1 = arith.constant 0 : i32
    return %c0_i32, %c0_i32_0 : i32, i32
  }
  func.func @transform_3(%arg0: i32) -> (i32, i32) {
    %c0_i32 = arith.constant 0 : i32
    %c0_i32_0 = arith.constant 0 : i32
    %c0_i32_1 = arith.constant 0 : i32
    return %c0_i32, %c0_i32_0 : i32, i32
  }
  func.func @transform_4(%arg0: i32) -> (i32, i32) {
    %c0_i32 = arith.constant 0 : i32
    %c0_i32_0 = arith.constant 0 : i32
    %c0_i32_1 = arith.constant 0 : i32
    return %c0_i32, %c0_i32_0 : i32, i32
  }
  func.func @transform_5(%arg0: i32) -> (i32, i32) {
    %c0_i32 = arith.constant 0 : i32
    %c0_i32_0 = arith.constant 0 : i32
    %c0_i32_1 = arith.constant 0 : i32
    return %c0_i32, %c0_i32_0 : i32, i32
  }
  func.func @transform_6(%arg0: i32) -> (i32, i32) {
    %c0_i32 = arith.constant 0 : i32
    %c0_i32_0 = arith.constant 0 : i32
    %c0_i32_1 = arith.constant 0 : i32
    return %c0_i32, %c0_i32_0 : i32, i32
  }
  func.func @transform_7(%arg0: i32) -> (i32, i32, i32) {
    %c0_i32 = arith.constant 0 : i32
    %c0_i32_0 = arith.constant 0 : i32
    %c0_i32_1 = arith.constant 0 : i32
    return %arg0, %c0_i32, %c0_i32_0 : i32, i32, i32
  }
}

</mosaic_0001>

<bundles_post_ra>
// kernel: tpu_custom_call.1
= control target key start
LH: loop header
LB: loop body
LE: loop exit
PB: predicated region body
PF: predicated region fallthrough
CT: control target
= control target key end

     0   :  { %12 = vsyncpa [#allocation3], 0  ;;  %s3326_s0 = inlined_call_operand.vmem [shape: f32[4,16,128], index: 0, kind: input, shape index: {}]   ;;  %s3327_s1 = inlined_call_operand.vmem [shape: f32[32,16], index: 1, kind: input, shape index: {}]   ;;  %s3328_s2 = inlined_call_operand.vmem [shape: f32[32,1], index: 2, kind: input, shape index: {}]   ;;  %s3329_s3 = inlined_call_operand.vmem [shape: f32[64,12], index: 3, kind: input, shape index: {}]   ;;  %s3330_s4 = inlined_call_operand.vmem [shape: f32[64,1], index: 4, kind: input, shape index: {}]   ;;  %s3331_s5 = inlined_call_operand.vmem [shape: f32[4,32], index: 5, kind: input, shape index: {}]   ;;  %s3332_s6 = inlined_call_operand.vmem [shape: f32[4,1], index: 6, kind: input, shape index: {}]   ;;  %s3333_s7 = inlined_call_operand.hbm [shape: f32[4,4,128], index: 7, kind: output, shape index: {}]  }
   0x1   :  { %14 = vsyncpa [#allocation3 + $0x1], 0  ;;  %s2123_s24 = smov 0   ;;  %s2125_s25 = smov 0  }
   0x2   :  { %s2127_s26 = smov 0   ;;  %s2129_s27 = smov 0  }
   0x3 LB: > { %s2144_s28 = sadd.s32 4294967295, %s2062_s27   ;;  %s1770_s29 = sadd.s32 4294967294, %s2062_s27   ;;  %s2062_s27 = sphi %s2129_s27, %s3411_s27   ;;  %s2058_s26 = sphi %s2127_s26, %s3410_s26   ;;  %s2054_s25 = sphi %s2125_s25, %s3409_s25   ;;  %s2050_s24 = sphi %s2123_s24, %s3408_s24  }
   0x4   : > { %s2148_s30 = sadd.s32 1, %s2062_s27   ;;  %s179_s8 = sadd.s32 1, %s2058_s26 }
   0x5   : > { %s176_s9 = ssub.s32 %s2062_s27, %s2148_s30  ;;  %p189_p0 = scmp.ne.s32.totalorder %s2058_s26, %s2054_s25 }
   0x6   : > { %p177_p1 = scmp.eq.s32.totalorder %s176_s9, 0  ;;  %p190_p2 = scmp.eq.s32.totalorder %s2144_s28, 1 }
   0x7   : > { %p195_p3 = scmp.ne.s32.totalorder %s2054_s25, %s2050_s24  ;;  %p196_p4 = scmp.eq.s32.totalorder %s1770_s29, 1 }
   0x8   : > { %s2159_s10 = scalar_select %p177_p1, %s2058_s26, %s179_s8  }
   0x9   : > { %p2161_p5 = por %p190_p2, %p189_p0  ;;  %p2165_p6 = por %p196_p4, %p195_p3 }
   0xa   : > { %p1773_p7 = scmp.ge.s32.totalorder %s2062_s27, 1  ;;  %p242_p8 = scmp.lt.s32.totalorder %s2062_s27, 3 }
   0xc   : > { %p243_p9 = pnand %p1773_p7, %p242_p8 }
   0xd   : > { %s3334_s13 = sand.u32 (!%p243_p9), 1, %s2054_s25   ;;  %s1775_s14 = sshll.u32 (!%p243_p9), %s2144_s28, 1 }
   0xe   : > { %246 = sbr.rel (%p243_p9) target bundleno = 739 (0x2e3), region = 48  ;;  %s2175_s15 = sshll.u32 (!%p243_p9), %s3334_s13, 3 }
   0xf   : > { %p276_p10 = scmp.lt.s32.totalorder (!%p243_p9), %s1775_s14, 3  ;;  %s274_s20 = scalar_lea.vmem (!%p243_p9), [#allocation2], %s2175_s15 }
  0x10   : > { %s2183_s21 = smov (!%p243_p9), 0  }
  0x13   : > { %s3413_s14 = smov (!%p276_p10, %s1775_s14), 3 }
  0x14   : > { %s1854_s16 = sshll.u32 %s3413_s14, 4 }
  0x15   : > { %s2180_s19 = scalar_lea.vmem %s3326_s0, %s1854_s16 }
  0x16 LB: >> { %v289_v0 = vld [vmem:[%s3327_s1] sm:$0xff]  ;;  %vm321_vm0 = vcmask 130048   ;;  %v2068_v1 = vmov 0   ;;  %v299_v2 = vld [vmem:[%s3328_s2 + $0x10] sm:$0xff]  ;;  %s1778_s9 = sshll.u32 %s2066_s21, 4  ;;  %v300_v3 = vld [vmem:[%s3328_s2 + $0x18] sm:$0xff]  ;;  %s2066_s21 = sphi %s2183_s21, %s288_s21  }
  0x17   : >> { %1871 = vmatprep.mubr.msk.f32.mxu0 %vm321_vm0, %v289_v0  ;;  %1950 = vset.pattern.permute.xlu1 %v2068_v1  ;;  %s294_s14 = scalar_lea.vmem %s2180_s19, %s1778_s9  ;;  %v297_v4 = vld [vmem:[%s3328_s2] sm:$0xff]  ;;  %v298_v7 = vld [vmem:[%s3328_s2 + $0x8] sm:$0xff]  ;;  %v291_v9 = vld [vmem:[%s3327_s1 + $0x10] sm:$0xff]  ;;  %v2069_v12 = vmov 3   ;;  %v2070_v16 = vmov 4   ;;  %v2071_v17 = vmov 5  }
  0x18   : >> { %313 = vperm.xlu1 %1950, %v299_v2   ;;  %1949 = vset.pattern.permute.xlu0 %v2068_v1  ;;  %v296_v5 = vld [vmem:[%s294_s14 + $0x8] sm:$0xff]  ;;  %v295_v6 = vld [vmem:[%s294_s14] sm:$0xff]  ;;  %v292_v11 = vld [vmem:[%s3327_s1 + $0x18] sm:$0xff]  ;;  %v2072_v18 = vmov 7   ;;  %v2073_v19 = vmov 8   ;;  %v2074_v20 = vmov 9  }
  0x19   : >> { %303 = vperm.xlu0 %1949, %v297_v4   ;;  %1867 = vmatprep.subr.mxu0 %v296_v5  ;;  %v290_v8 = vld [vmem:[%s3327_s1 + $0x8] sm:$0xff]  ;;  %v700_v13 = vld [vmem:[%s3329_s3 + $0x10] sm:$0xff]  ;;  %v698_v14 = vld [vmem:[%s3329_s3] sm:$0xff]  ;;  %v2075_v21 = vmov 6   ;;  %v3335_v31 = vmov 0.0   ;;  %vm2078_vm4 = vmmov 1  }
  0x1a   : >> { %1868 = vmatpush3.msra.mxu0 %v296_v5  ;;  %v2217_v10 = vld [vmem:[%s3329_s3 + $0x8] sm:$0xff]  ;;  %v701_v15 = vld [vmem:[%s3329_s3 + $0x18] sm:$0xff]  ;;  %v1291_v24 = vld [vmem:[%s3329_s3 + $0x30] sm:$0xff]  ;;  %1877 = vmatprep.subr.mxu1 %v3335_v31  ;;  %s1848_s9 = sshll.u32 %s2066_s21, 2  ;;  %s288_s21 = sadd.s32 1, %s2066_s21  }
  0x1b   : >> { %1869 = vmatprep.subr.mxu0 %v295_v6  ;;  %v971_v22 = vld [vmem:[%s3330_s4 + $0x8] sm:$0xff]  ;;  %v1292_v23 = vld [vmem:[%s3329_s3 + $0x38] sm:$0xff]  ;;  %v970_v26 = vld [vmem:[%s3330_s4] sm:$0xff]  ;;  %s1683_s16 = scalar_lea.vmem %s274_s20, %s1848_s9 [#allocation2]  ;;  %p285_p11 = scmp.ge.s32.totalorder %s288_s21, 2  }
  0x1c   : >> { %318 = vperm.xlu1 %1950, %v300_v3   ;;  %1870 = vmatpush3.msra.mxu0 %v295_v6  ;;  %v1290_v25 = vld [vmem:[%s3329_s3 + $0x28] sm:$0xff]  ;;  %v972_v27 = vld [vmem:[%s3330_s4 + $0x10] sm:$0xff]  ;;  %v973_v28 = vld [vmem:[%s3330_s4 + $0x18] sm:$0xff]  ;;  %s1855_s17 = sshll.u32 (%p285_p11), %s2144_s28, 7  ;;  %s1699_s22 = sshll.u32 (%p285_p11), %s274_s20, 4  ;;  %s3282_s22 = int_to_ptr.vmem [resolvable:$true] %s1699_s22 }
  0x1d   : >> { %308 = vperm.xlu0 %1949, %v298_v7   ;;  %1872 = vmatmul.mubr.msk.f32.vlgmr.msra.gmra.mxu0 %vm321_vm0, %v290_v8  ;;  %v1289_v29 = vld [vmem:[%s3329_s3 + $0x20] sm:$0xff]  ;;  %v1562_v30 = vld [vmem:[%s3330_s4 + $0x28] sm:$0xff]  ;;  %v1564_v33 = vld [vmem:[%s3330_s4 + $0x38] sm:$0xff]  ;;  %s3278_s13 = scalar_lea.hbm (%p285_p11), %s3333_s7, %s1855_s17  ;;  %s3407_s23 = sand.u32 (%p285_p11), 1, %s2054_s25  }
  0x1e   : >> { %1874 = vmatprep.mubr.msk.f32.mxu0 %vm321_vm0, %v291_v9  ;;  %v1563_v34 = vld [vmem:[%s3330_s4 + $0x30] sm:$0xff]  ;;  %v1561_v36 = vld [vmem:[%s3330_s4 + $0x20] sm:$0xff]  ;;  %s3286_s21 = scalar_lea.sflag (%p285_p11), [#allocation3], %s3407_s23  ;;  %s1998_s19 = scalar_lea.vmem (%p285_p11), %s3282_s22, 128 }
  0x1f   : >> { %v1602_v38 = vld [vmem:[%s3332_s6] sm:$0xf]  ;;  %p1999_p12 = scmp.ne.s32.totalorder (%p285_p11), %s3282_s22, %s1998_s19  ;;  %s2080_s28 = smov (%p285_p11), [#allocation2]  }
  0x20   : >> { %1952 = vset.pattern.permute.xlu1 %v2069_v12  ;;  %s2002_s29 = sshll.u32 (%p285_p11), %s2080_s28, 4  ;;  %s2003_s29 = int_to_ptr.vmem [resolvable:$false] %s2002_s29 }
  0x21   : >> { %709 = vperm.xlu1 %1952, %v2217_v10   ;;  %1951 = vset.pattern.permute.xlu0 %v2069_v12  ;;  %p2000_p13 = pnand (%p285_p11), %p1999_p12, %p2161_p5  ;;  %s2004_s8 = scalar_lea.vmem (%p285_p11), %s2003_s29, 256 }
  0x22   : >> { %1875 = vmatmul.mubr.msk.f32.gmra.mxu0 %vm321_vm0, %v292_v11  ;;  %704 = vperm.xlu0 %1951, %v698_v14   ;;  %p2005_p1 = scmp.lt.s32.totalorder (%p285_p11), %s3282_s22, %s2003_s29  ;;  %p2006_p2 = scmp.lt.s32.totalorder (%p285_p11), %s2004_s8, %s1998_s19 }
  0x23   : > { %p2001_p0 = pneg (%p285_p11), %p2000_p13 }
  0x24   : > { %p2007_p3 = por (%p285_p11), %p2006_p2, %p2005_p1 }
  0x25   : >> { %714 = vperm.xlu1 %1952, %v700_v13  }
  0x26   : >> { %719 = vperm.xlu0 %1951, %v701_v15   ;;  %p2008_p4 = pnand (%p285_p11), %p2007_p3, %p2001_p0 }
  0x29   : >> { %1953 = vset.pattern.permute.xlu1 %v2070_v16 }
  0x2a   : >> { %751 = vperm.xlu1 %1953, %v698_v14   ;;  %1954 = vset.pattern.permute.xlu0 %v2070_v16 }
  0x2b   : >> { %755 = vperm.xlu0 %1954, %v2217_v10  }
  0x2e   : >> { %759 = vperm.xlu1 %1953, %v700_v13  }
  0x2f   : >> { %1955 = vset.pattern.permute.xlu0 %v2071_v17 }
  0x30   : >> { %791 = vperm.xlu0 %1955, %v698_v14  }
  0x32   : >> { %763 = vperm.xlu1 %1953, %v701_v15  }
  0x34   : >> { %803 = vperm.xlu0 %1955, %v701_v15  }
  0x36   : >> { %1956 = vset.pattern.permute.xlu1 %v2071_v17 }
  0x37   : >> { %795 = vperm.xlu1 %1956, %v2217_v10  }
  0x38   : >> { %1958 = vset.pattern.permute.xlu0 %v2072_v18 }
  0x39   : >> { %871 = vperm.xlu0 %1958, %v2217_v10  }
  0x3b   : >> { %799 = vperm.xlu1 %1956, %v700_v13  }
  0x3d   : >> { %1959 = vset.pattern.permute.xlu0 %v2073_v19 }
  0x3e   : >> { %915 = vperm.xlu0 %1959, %v698_v14  }
  0x3f   : >> { %1957 = vset.pattern.permute.xlu1 %v2072_v18 }
  0x40   : >> { %867 = vperm.xlu1 %1957, %v698_v14  }
  0x42   : >> { %927 = vperm.xlu0 %1959, %v701_v15  }
  0x44   : >> { %875 = vperm.xlu1 %1957, %v700_v13  }
  0x46   : >> { %1962 = vset.pattern.permute.xlu0 %v2074_v20 }
  0x47   : >> { %951 = vperm.xlu0 %1962, %v2217_v10  }
  0x48   : >> { %879 = vperm.xlu1 %1957, %v701_v15  }
  0x4b   : >> { %1963 = vset.pattern.permute.xlu0 %v2075_v21 }
  0x4c   : >> { %1960 = vset.pattern.permute.xlu1 %v2073_v19  ;;  %827 = vperm.xlu0 %1963, %v698_v14  }
  0x4d   : >> { %919 = vperm.xlu1 %1960, %v2217_v10  }
  0x50   : >> { %839 = vperm.xlu0 %1963, %v701_v15  }
  0x51   : >> { %923 = vperm.xlu1 %1960, %v700_v13  }
  0x54   : >> { %1966 = vset.pattern.permute.xlu0 %v2068_v1 }
  0x55   : >> { %1961 = vset.pattern.permute.xlu1 %v2074_v20  ;;  %993 = vperm.xlu0 %1966, %v971_v22   ;;  %v3337_v22 = vmov 1.0  }
  0x56   : >> { %947 = vperm.xlu1 %1961, %v698_v14  }
  0x59   : >> { %1967 = vset.pattern.permute.xlu0 %v2069_v12 }
  0x5a   : >> { %955 = vperm.xlu1 %1961, %v700_v13   ;;  %1310 = vperm.xlu0 %1967, %v1292_v23  }
  0x5e   : >> { %959 = vperm.xlu1 %1961, %v701_v15   ;;  %1305 = vperm.xlu0 %1967, %v1291_v24  }
  0x62   : >> { %1964 = vset.pattern.permute.xlu1 %v2075_v21  ;;  %1976 = vset.pattern.permute.xlu0 %v2074_v20 }
  0x63   : >> { %831 = vperm.xlu1 %1964, %v2217_v10   ;;  %1546 = vperm.xlu0 %1976, %v1291_v24  }
  0x67   : >> { %835 = vperm.xlu1 %1964, %v700_v13   ;;  %1979 = vset.pattern.permute.xlu0 %v2071_v17 }
  0x68   : >> { %1386 = vperm.xlu0 %1979, %v1290_v25  }
  0x6b   : >> { %1965 = vset.pattern.permute.xlu1 %v2068_v1 }
  0x6c   : >> { %988 = vperm.xlu1 %1965, %v970_v26   ;;  %1982 = vset.pattern.permute.xlu0 %v2073_v19 }
  0x6d   : >> { %1510 = vperm.xlu0 %1982, %v1290_v25  }
  0x70   : >> { %998 = vperm.xlu1 %1965, %v972_v27  }
  0x71   : >> { %1985 = vset.pattern.permute.xlu0 %v2070_v16 }
  0x72   : >> { %1342 = vperm.xlu0 %1985, %v1289_v29  }
  0x74   : >> { %1003 = vperm.xlu1 %1965, %v973_v28  }
  0x76   : >> { %1986 = vset.pattern.permute.xlu0 %v2072_v18 }
  0x77   : >> { %1470 = vperm.xlu0 %1986, %v1292_v23  }
  0x78   : >> { %1968 = vset.pattern.permute.xlu1 %v2070_v16 }
  0x79   : >> { %1354 = vperm.xlu1 %1968, %v1292_v23  }
  0x7b   : >> { %1458 = vperm.xlu0 %1986, %v1289_v29  }
  0x7d   : >> { %1969 = vset.pattern.permute.xlu1 %v2071_v17 }
  0x7e   : >> { %1394 = vperm.xlu1 %1969, %v1292_v23  }
  0x7f   : >> { %1989 = vset.pattern.permute.xlu0 %v2075_v21 }
  0x80   : >> { %1430 = vperm.xlu0 %1989, %v1292_v23  }
  0x82   : >> { %1970 = vset.pattern.permute.xlu1 %v2073_v19 }
  0x83   : >> { %1518 = vperm.xlu1 %1970, %v1292_v23  }
  0x84   : >> { %1418 = vperm.xlu0 %1989, %v1289_v29  }
  0x87   : >> { %1971 = vset.pattern.permute.xlu1 %v2074_v20 }
  0x88   : >> { %1550 = vperm.xlu1 %1971, %v1292_v23   ;;  %1993 = vset.pattern.permute.xlu0 %v2068_v1 }
  0x89   : >> { %1584 = vperm.xlu0 %1993, %v1562_v30  }
  0x8c   : >> { %1972 = vset.pattern.permute.xlu1 %v2070_v16 }
  0x8d   : >> { %1350 = vperm.xlu1 %1972, %v1291_v24  }
  0x91   : >> { %1973 = vset.pattern.permute.xlu1 %v2071_v17 }
  0x92   : >> { %1390 = vperm.xlu1 %1973, %v1291_v24  }
  0x93   : >> { %v314_v32 = vpop.permute.xlu1 %313 }
  0x94   : >> { %v304_v39 = vpop.permute.xlu0 %303 }
  0x96   : >> { %1974 = vset.pattern.permute.xlu1 %v2072_v18 }
  0x97   : >> { %1466 = vperm.xlu1 %1974, %v1291_v24   ;;  %v319_v35 = vpop.permute.xlu1 %318 }
  0x98   : >> { %v309_v43 = vpop.permute.xlu0 %308 }
  0x9b   : >> { %1975 = vset.pattern.permute.xlu1 %v2073_v19 }
  0x9c   : >> { %1514 = vperm.xlu1 %1975, %v1291_v24   ;;  %v2321_v37 = vpop.permute.xlu1 %709 }
  0x9d   : >> { %3352 = vst [vmem:[#allocation5_spill] sm:$0xff] %v2321_v37 }
  0xa0   : >> { %1977 = vset.pattern.permute.xlu1 %v2069_v12  ;;  %v2326_v41 = vpop.permute.xlu1 %714 }
  0xa1   : >> { %1300 = vperm.xlu1 %1977, %v1290_v25   ;;  %3353 = vst [vmem:[#allocation6_spill] sm:$0xff] %v2326_v41 }
  0xa5   : >> { %1978 = vset.pattern.permute.xlu1 %v2070_v16  ;;  %v2332_v50 = vpop.permute.xlu1 %751 }
  0xa6   : >> { %1346 = vperm.xlu1 %1978, %v1290_v25   ;;  %3354 = vst [vmem:[#allocation7_spill] sm:$0xff] %v2332_v50 }
  0xa9   : >> { %v2338_v59 = vpop.permute.xlu1 %759 }
  0xaa   : >> { %1980 = vset.pattern.permute.xlu1 %v2075_v21  ;;  %3355 = vst [vmem:[#allocation8_spill] sm:$0xff] %v2338_v59 }
  0xab   : >> { %1426 = vperm.xlu1 %1980, %v1291_v24  }
  0xad   : >> { %v2340_v2 = vpop.permute.xlu1 %763 }
  0xae   : >> { %3356 = vst [vmem:[#allocation9_spill] sm:$0xff] %v2340_v2 }
  0xaf   : >> { %1981 = vset.pattern.permute.xlu1 %v2072_v18 }
  0xb0   : >> { %1462 = vperm.xlu1 %1981, %v1290_v25  }
  0xb2   : >> { %v2344_v7 = vpop.permute.xlu1 %795 }
  0xb3   : >> { %3357 = vst [vmem:[#allocation10_spill] sm:$0xff] %v2344_v7 }
  0xb4   : >> { %1983 = vset.pattern.permute.xlu1 %v2074_v20 }
  0xb5   : >> { %1542 = vperm.xlu1 %1983, %v1290_v25  }
  0xb6   : >> { %v2347_v9 = vpop.permute.xlu1 %799 }
  0xb9   : >> { %1984 = vset.pattern.permute.xlu1 %v2069_v12 }
  0xba   : >> { %1295 = vperm.xlu1 %1984, %v1289_v29  }
  0xbb   : >> { %v2349_v10 = vpop.permute.xlu1 %867 }
  0xbe   : >> { %1987 = vset.pattern.permute.xlu1 %v2071_v17 }
  0xbf   : >> { %1382 = vperm.xlu1 %1987, %v1289_v29   ;;  %v2351_v13 = vpop.permute.xlu1 %875 }
  0xc0   : >> { %3358 = vst [vmem:[#allocation11_spill] sm:$0xff] %v2351_v13 }
  0xc3   : >> { %1988 = vset.pattern.permute.xlu1 %v2075_v21 }
  0xc4   : >> { %1422 = vperm.xlu1 %1988, %v1290_v25  }
  0xc8   : >> { %1990 = vset.pattern.permute.xlu1 %v2073_v19  ;;  %v2360_v19 = vpop.permute.xlu1 %879 }
  0xc9   : >> { %1506 = vperm.xlu1 %1990, %v1289_v29  }
  0xcd   : >> { %1991 = vset.pattern.permute.xlu1 %v2074_v20 }
  0xce   : >> { %1538 = vperm.xlu1 %1991, %v1289_v29  }
  0xd2   : >> { %1992 = vset.pattern.permute.xlu1 %v2068_v1 }
  0xd3   : >> { %1594 = vperm.xlu1 %1992, %v1564_v33  }
  0xd7   : >> { %1589 = vperm.xlu1 %1992, %v1563_v34  }
  0xdb   : >> { %1579 = vperm.xlu1 %1992, %v1561_v36  }
  0xdd   : >> { %v1873_v40 = vpop.f32.mrf.mxu0 }
  0xde   : >> { %v2330_v47 = vadd.f32 %v1873_v40, %v309_v43 }
  0xdf   : >> { %1605 = vperm.xlu1 %1992, %v1602_v38   ;;  %v400_v42 = vpop.f32.mrf.mxu0 }
  0xe0   : >> { %v2328_v45 = vadd.f32 %v400_v42, %v304_v39 }
  0xe2   : >> { %v1876_v44 = vpop.f32.mrf.mxu0  ;;  %v419_v51 = vmin.f32 %v2328_v45, %v2330_v47  ;;  %v428_v52 = vmax.f32 %v2328_v45, %v2330_v47 }
  0xe3   : >> { %v416_v48 = vadd.f32 %v1876_v44, %v319_v35 }
  0xe4   : >> { %v410_v46 = vpop.f32.mrf.mxu0 }
  0xe5   : >> { %v411_v49 = vadd.f32 %v410_v46, %v314_v32  ;;  %v2387_v32 = vpop.permute.xlu1 %919 }
  0xe6   : >> { %3359 = vst [vmem:[#allocation12_spill] sm:$0xff] %v2387_v32 }
  0xe7   : >> { %v420_v53 = vmin.f32 %v411_v49, %v416_v48  ;;  %v429_v54 = vmax.f32 %v411_v49, %v416_v48 }
  0xe9   : >> { %v421_v55 = vmin.f32 %v419_v51, %v420_v53  ;;  %v430_v56 = vmax.f32 %v428_v52, %v429_v54 }
  0xeb   : >> { %v422_v57 = vrot.slane %v421_v55, 4  ;;  %v431_v58 = vrot.slane %v430_v56, 4 }
  0xed   : >> { %v423_v60 = vmin.f32 %v421_v55, %v422_v57  ;;  %v432_v61 = vmax.f32 %v430_v56, %v431_v58 }
  0xef   : >> { %v424_v62 = vrot.slane %v423_v60, 2  ;;  %v433_v63 = vrot.slane %v432_v61, 2 }
  0xf1   : >> { %v425_v0 = vmin.f32 %v423_v60, %v424_v62  ;;  %v434_v1 = vmax.f32 %v432_v61, %v433_v63  ;;  %v2410_v63 = vpop.permute.xlu1 %923 }
  0xf2   : >> { %3360 = vst [vmem:[#allocation13_spill] sm:$0xff] %v2410_v63 }
  0xf3   : >> { %v426_v3 = vrot.slane %v425_v0, 1  ;;  %v435_v4 = vrot.slane %v434_v1, 1 }
  0xf5   : >> { %v2342_v5 = vmin.f32 %v425_v0, %v426_v3  ;;  %v436_v6 = vmax.f32 %v434_v1, %v435_v4 }
  0xf7   : >> { %v437_v8 = vsub.f32 %v436_v6, %v2342_v5  ;;  %v444_v16 = vsub.f32 %v411_v49, %v2342_v5  ;;  %v445_v17 = vsub.f32 %v416_v48, %v2342_v5 }
  0xf9   : >> { %1994 = vrcp.f32 %v437_v8 }
 0x106   : >> { %v1995_v11 = vpop.eup %1994 }
 0x107   : >> { %v439_v12 = vmul.f32 %v1995_v11, %v437_v8 }
 0x109   : >> { %v440_v14 = vsub.f32 2.0, %v439_v12 }
 0x10b   : >> { %v2353_v15 = vmul.f32 %v1995_v11, %v440_v14 }
 0x10d   : >> { %v2358_v18 = vmul.f32 %v444_v16, %v2353_v15  ;;  %v2363_v20 = vmul.f32 %v445_v17, %v2353_v15 }
 0x10f   : >> { %vm452_vm1 = vcmp.ge.f32.partialorder %v2358_v18, 0.33333334  ;;  %vm460_vm2 = vcmp.ge.f32.partialorder %v2358_v18, 0.6666667  ;;  %vm476_vm3 = vcmp.ge.f32.partialorder %v2358_v18, 1.0  ;;  %v508_v21 = vmul.f32 3.0, %v2358_v18 }
 0x110   : >> { %v456_v23 = vsel %vm452_vm1, 0.0, %v3337_v22  ;;  %vm464_vm5 = vmxor %vm460_vm2, %vm2078_vm4  ;;  %v492_v24 = vsel %vm476_vm3, 1.0, %v3335_v31  ;;  %v2377_v25 = vadd.f32 -0.33333334, %v2358_v18  ;;  %v2380_v26 = vadd.f32 -0.6666667, %v2358_v18 }
 0x111   : >> { %vm468_vm6 = vmand %vm452_vm1, %vm464_vm5  ;;  %v512_v27 = vmul.f32 %v508_v21, %v456_v23  ;;  %v1793_v28 = vadd.f32 -1.0, %v2358_v18  ;;  %v2384_v29 = vadd.f32 -1.001, %v2358_v18  ;;  %v1801_v30 = vadd.f32 0.001, %v2358_v18 }
 0x112   : >> { %v472_v33 = vsel %vm468_vm6, 1.0, %v3335_v31  ;;  %vm480_vm7 = vmxor %vm476_vm3, %vm2078_vm4  ;;  %v500_v34 = vmul.f32 -3.0, %v2377_v25  ;;  %v520_v35 = vmul.f32 -3.0, %v2380_v26  ;;  %v532_v36 = vmul.f32 3.0, %v2377_v25 }
 0x113   : >> { %vm484_vm8 = vmand %vm460_vm2, %vm480_vm7  ;;  %v544_v38 = vmul.f32 -3.0, %v1793_v28  ;;  %v556_v39 = vmul.f32 3.0, %v2380_v26  ;;  %v568_v40 = vmul.f32 -1000.0, %v2384_v29  ;;  %v580_v42 = vmul.f32 1000.0, %v1793_v28 }
 0x114   : >> { %v488_v43 = vsel %vm484_vm8, 1.0, %v3335_v31  ;;  %v2401_v44 = vmul.f32 %v500_v34, %v456_v23  ;;  %v524_v46 = vmul.f32 %v520_v35, %v472_v33  ;;  %v536_v48 = vmul.f32 %v532_v36, %v472_v33 }
 0x115   : >> { %v548_v49 = vmul.f32 %v544_v38, %v488_v43  ;;  %v560_v51 = vmul.f32 %v556_v39, %v488_v43  ;;  %v572_v52 = vmul.f32 %v568_v40, %v492_v24  ;;  %v584_v53 = vmul.f32 %v580_v42, %v492_v24 }
 0x116   : >> { %v528_v54 = vadd.f32 %v524_v46, %v512_v27  ;;  %v600_v55 = vmul.f32 2.9910269, %v1801_v30  ;;  %v608_v56 = vmul.f32 -1.5, %v2380_v26  ;;  %v620_v57 = vmul.f32 1.5, %v2358_v18 }
 0x117   : >> { %v2405_v58 = vadd.f32 %v548_v49, %v536_v48  ;;  %v2407_v60 = vadd.f32 %v572_v52, %v560_v51  ;;  %v628_v61 = vmul.f32 -1.5, %v1793_v28  ;;  %v660_v62 = vmul.f32 2.9910269, %v2380_v26 }
 0x118   : >> { %v604_v0 = vmul.f32 %v600_v55, %v2401_v44  ;;  %v612_v1 = vmul.f32 %v608_v56, %v528_v54  ;;  %v624_v3 = vmul.f32 %v620_v57, %v528_v54  ;;  %v2414_v4 = vadd.f32 -1.0015, %v2358_v18 }
 0x119   : >> { %v632_v6 = vmul.f32 %v628_v61, %v2405_v58  ;;  %v664_v11 = vmul.f32 %v660_v62, %v2407_v60  ;;  %v772_v14 = vmul.f32 1.4977534, %v1801_v30  ;;  %v684_v17 = vmul.f32 666.6667, %v1793_v28  ;;  %v2433_v30 = vpop.permute.xlu1 %947 }
 0x11a   : >> { %v2417_v8 = vadd.f32 %v612_v1, %v604_v0  ;;  %v672_v12 = vmul.f32 -666.6667, %v2414_v4  ;;  %v780_v21 = vmul.f32 -1.0, %v1793_v28  ;;  %v1813_v23 = vadd.f32 -1.002, %v2358_v18  ;;  %3361 = vst [vmem:[#allocation14_spill] sm:$0xff] %v2433_v30 }
 0x11b   : >> { %v2421_v16 = vadd.f32 %v632_v6, %v624_v3  ;;  %vm461_vm9 = vcmp.ge.f32.partialorder %v2363_v20, 0.6666667  ;;  %vm477_vm10 = vcmp.ge.f32.partialorder %v2363_v20, 1.0  ;;  %v442_v33 = vsub.f32 %v2328_v45, %v2342_v5 }
 0x11c   : >> { %v676_v24 = vmul.f32 %v672_v12, %v584_v53  ;;  %v776_v27 = vmul.f32 %v772_v14, %v2417_v8  ;;  %v688_v34 = vmul.f32 %v684_v17, %v584_v53  ;;  %vm481_vm11 = vmxor %vm477_vm10, %vm2078_vm4  ;;  %v2440_v38 = vadd.f32 -0.6666667, %v2363_v20 }
 0x11d   : >> { %v784_v35 = vmul.f32 %v780_v21, %v2421_v16  ;;  %vm485_vm12 = vmand %vm461_vm9, %vm481_vm11  ;;  %v2443_v39 = vadd.f32 -1.0, %v2363_v20  ;;  %v2446_v45 = vadd.f32 -1.001, %v2363_v20  ;;  %v2449_v40 = vmul.f32 %v442_v33, %v2353_v15  ;;  %v956_v6 = vpop.permute.xlu1 %955 }
 0x11e   : >> { %v2435_v36 = vadd.f32 %v676_v24, %v664_v11  ;;  %v892_v43 = vmul.f32 2.9865606, %v2380_v26  ;;  %v940_v46 = vmul.f32 500.0, %v1793_v28  ;;  %v904_v48 = vmul.f32 -500.0, %v1813_v23 }
 0x11f   : >> { %3362 = vst [vmem:[#allocation15_spill] sm:$0xff] %v2443_v39  ;;  %3363 = vst [vmem:[#allocation16_spill] sm:$0xff] %v2446_v45  ;;  %v788_v42 = vadd.f32 %v784_v35, %v776_v27  ;;  %v489_v49 = vsel %vm485_vm12, 1.0, %v3335_v31  ;;  %v557_v51 = vmul.f32 3.0, %v2440_v38  ;;  %v569_v52 = vmul.f32 -1000.0, %v2446_v45 }
 0x120   : >> { %v896_v53 = vmul.f32 %v892_v43, %v2435_v36  ;;  %v944_v54 = vmul.f32 %v940_v46, %v688_v34  ;;  %v581_v55 = vmul.f32 1000.0, %v2443_v39  ;;  %v443_v56 = vsub.f32 %v2330_v47, %v2342_v5 }
 0x121   : >> { %v908_v57 = vmul.f32 %v904_v48, %v688_v34  ;;  %v493_v28 = vsel %vm477_vm10, 1.0, %v3335_v31  ;;  %v545_v61 = vmul.f32 -3.0, %v2443_v39  ;;  %v808_v62 = vmul.f32 %v2347_v9, %v788_v42 }
 0x122   : >> { %v561_v0 = vmul.f32 %v557_v51, %v489_v49  ;;  %v573_v1 = vmul.f32 %v569_v52, %v493_v28  ;;  %v2465_v3 = vadd.f32 -1.0015, %v2363_v20  ;;  %v585_v11 = vmul.f32 %v581_v55, %v493_v28 }
 0x123   : >> { %vm450_vm13 = vcmp.ge.f32.partialorder %v2449_v40, 0.33333334  ;;  %vm458_vm14 = vcmp.ge.f32.partialorder %v2449_v40, 0.6666667  ;;  %vm474_vm15 = vcmp.ge.f32.partialorder %v2449_v40, 1.0  ;;  %v2471_v47 = vmul.f32 %v443_v56, %v2353_v15 }
 0x124   : >> { %v2473_v5 = vadd.f32 %v908_v57, %v896_v53  ;;  %v964_v12 = vmul.f32 %v956_v6, %v944_v54  ;;  %v685_v9 = vmul.f32 666.6667, %v2443_v39  ;;  %vm462_vm0 = vmxor %vm458_vm14, %vm2078_vm4  ;;  %v2479_v14 = vmul.f32 %v545_v61, %v489_v49 }
 0x125   : >> { %vm466_vm1 = vmand %vm450_vm13, %vm462_vm0  ;;  %v1783_v17 = vadd.f32 -0.33333334, %v2449_v40  ;;  %v2485_v21 = vadd.f32 -0.6666667, %v2449_v40  ;;  %v2488_v15 = vadd.f32 -1.0, %v2449_v40  ;;  %v2502_v34 = vadd.f32 %v573_v1, %v561_v0 }
 0x126   : >> { %3364 = vst [vmem:[#allocation17_spill] sm:$0xff] %v2473_v5  ;;  %v2490_v23 = vadd.f32 %v964_v12, %v808_v62  ;;  %v673_v24 = vmul.f32 -666.6667, %v2465_v3  ;;  %v2494_v27 = vsel %vm466_vm1, 1.0, %v3335_v31  ;;  %vm478_vm2 = vmxor %vm474_vm15, %vm2078_vm4  ;;  %v2500_v33 = vadd.f32 -1.001, %v2449_v40 }
 0x127   : >> { %v2504_v35 = vmul.f32 %v685_v9, %v585_v11  ;;  %v941_v42 = vmul.f32 500.0, %v2443_v39  ;;  %vm482_vm3 = vmand %vm458_vm14, %vm478_vm2  ;;  %v530_v43 = vmul.f32 3.0, %v1783_v17  ;;  %v498_v48 = vmul.f32 -3.0, %v1783_v17 }
 0x128   : >> { %3365 = vst [vmem:[#allocation18_spill] sm:$0xff] %v2500_v33  ;;  %v486_v46 = vsel %vm482_vm3, 1.0, %v3335_v31  ;;  %v542_v49 = vmul.f32 -3.0, %v2488_v15  ;;  %v554_v51 = vmul.f32 3.0, %v2485_v21  ;;  %v490_v52 = vsel %vm474_vm15, 1.0, %v3335_v31 }
 0x129   : >> { %3366 = vst [vmem:[#allocation19_spill] sm:$0xff] %v2504_v35  ;;  %v534_v53 = vmul.f32 %v530_v43, %v2494_v27  ;;  %v566_v54 = vmul.f32 -1000.0, %v2500_v33  ;;  %v1803_v55 = vadd.f32 -1.0015, %v2449_v40  ;;  %v506_v56 = vmul.f32 3.0, %v2449_v40 }
 0x12a   : >> { %v546_v57 = vmul.f32 %v542_v49, %v486_v46  ;;  %v558_v28 = vmul.f32 %v554_v51, %v486_v46  ;;  %v578_v61 = vmul.f32 1000.0, %v2488_v15  ;;  %v2520_v62 = vmul.f32 %v673_v24, %v585_v11 }
 0x12b   : >> { %v2523_v0 = vmul.f32 %v941_v42, %v2504_v35  ;;  %v454_v1 = vsel %vm450_vm13, 0.0, %v3337_v22  ;;  %v570_v6 = vmul.f32 %v566_v54, %v490_v52  ;;  %v638_v49 = vmul.f32 1.5, %v1783_v17  ;;  %vm465_vm13 = vmxor %vm461_vm9, %vm2078_vm4 }
 0x12c   : >> { %v2528_v12 = vmul.f32 %v498_v48, %v454_v1  ;;  %v2530_v9 = vadd.f32 %v546_v57, %v534_v53  ;;  %v2532_v43 = vmul.f32 %v578_v61, %v490_v52  ;;  %v646_v51 = vmul.f32 -2.9910269, %v2500_v33 }
 0x12d   : >> { %v574_v46 = vadd.f32 %v570_v6, %v558_v28  ;;  %v658_v11 = vmul.f32 2.9910269, %v2485_v21  ;;  %v670_v24 = vmul.f32 -666.6667, %v1803_v55  ;;  %v2536_v42 = vmul.f32 %v506_v56, %v454_v1 }
 0x12e   : >> { %3367 = vst [vmem:[#allocation20_spill] sm:$0xff] %v2532_v43  ;;  %v2539_v31 = vmul.f32 -3.0, %v2485_v21  ;;  %v586_v22 = vmul.f32 -2.9910269, %v1783_v17  ;;  %v642_v48 = vmul.f32 %v638_v49, %v2530_v9  ;;  %vm451_vm5 = vcmp.ge.f32.partialorder %v2471_v47, 0.33333334 }
 0x12f   : >> { %v650_v54 = vmul.f32 %v646_v51, %v574_v46  ;;  %v662_v53 = vmul.f32 %v658_v11, %v574_v46  ;;  %v674_v52 = vmul.f32 %v670_v24, %v2532_v43  ;;  %vm459_vm6 = vcmp.ge.f32.partialorder %v2471_v47, 0.6666667 }
 0x130   : >> { %v2545_v57 = vmul.f32 %v586_v22, %v2528_v12  ;;  %vm475_vm7 = vcmp.ge.f32.partialorder %v2471_v47, 1.0  ;;  %v2550_v56 = vadd.f32 -0.33333334, %v2471_v47  ;;  %v1807_v1 = vadd.f32 0.0015, %v2449_v40  ;;  %vm463_vm8 = vmxor %vm459_vm6, %vm2078_vm4 }
 0x131   : >> { %v2552_v28 = vadd.f32 %v650_v54, %v642_v48  ;;  %v2554_v61 = vadd.f32 %v674_v52, %v662_v53  ;;  %v846_v6 = vmul.f32 1.4977534, %v1783_v17  ;;  %v854_v22 = vmul.f32 -2.9865606, %v1803_v55  ;;  %vm467_vm10 = vmand %vm451_vm5, %vm463_vm8 }
 0x132   : >> { %v507_v49 = vmul.f32 3.0, %v2471_v47  ;;  %v2564_v46 = vadd.f32 -0.6666667, %v2471_v47  ;;  %v531_v51 = vmul.f32 3.0, %v2550_v56  ;;  %v690_v11 = vmul.f32 -2.9865606, %v1783_v17  ;;  %vm479_vm11 = vmxor %vm475_vm7, %vm2078_vm4 }
 0x133   : >> { %3368 = vst [vmem:[#allocation21_spill] sm:$0xff] %v2552_v28  ;;  %3369 = vst [vmem:[#allocation22_spill] sm:$0xff] %v2554_v61  ;;  %v3370_v24 = vmov 1.0   ;;  %v3371_v54 = vmov 0.0   ;;  %v2577_v55 = vadd.f32 -1.0, %v2471_v47  ;;  %v850_v52 = vmul.f32 %v846_v6, %v2552_v28 }
 0x134   : >> { %v2570_v48 = vsel %vm451_vm5, 0.0, %v3370_v24  ;;  %v471_v53 = vsel %vm467_vm10, 1.0, %v3371_v54  ;;  %v858_v7 = vmul.f32 %v854_v22, %v2554_v61  ;;  %vm483_vm12 = vmand %vm459_vm6, %vm479_vm11  ;;  %v519_v17 = vmul.f32 -3.0, %v2564_v46 }
 0x135   : >> { %v555_v30 = vmul.f32 3.0, %v2564_v46  ;;  %v487_v33 = vsel %vm483_vm12, 1.0, %v3371_v54  ;;  %v535_v35 = vmul.f32 %v531_v51, %v471_v53  ;;  %v543_v2 = vmul.f32 -3.0, %v2577_v55 }
 0x136   : >> { %v1796_v50 = vadd.f32 -1.001, %v2471_v47  ;;  %v694_v37 = vmul.f32 %v690_v11, %v2545_v57  ;;  %v730_v43 = vmul.f32 2.9865606, %v1807_v1  ;;  %v511_v6 = vmul.f32 %v507_v49, %v2570_v48  ;;  %v705_v49 = vpop.permute.xlu0 %704 }
 0x137   : >> { %v523_v22 = vmul.f32 %v519_v17, %v471_v53  ;;  %v2596_v28 = vsel %vm475_vm7, 1.0, %v3371_v54  ;;  %v547_v51 = vmul.f32 %v543_v2, %v487_v33  ;;  %v559_v61 = vmul.f32 %v555_v30, %v487_v33 }
 0x138   : >> { %v567_v39 = vmul.f32 -1000.0, %v1796_v50  ;;  %v862_v59 = vadd.f32 %v858_v7, %v850_v52  ;;  %v619_v1 = vmul.f32 1.5, %v2471_v47  ;;  %vm453_vm14 = vcmp.ge.f32.partialorder %v2363_v20, 0.33333334 }
 0x139   : >> { %v2598_v13 = vadd.f32 %v523_v22, %v511_v6  ;;  %v551_v11 = vadd.f32 %v547_v51, %v535_v35  ;;  %v627_v17 = vmul.f32 -1.5, %v2577_v55  ;;  %v639_v41 = vmul.f32 1.5, %v2550_v56  ;;  %vm469_vm9 = vmand %vm453_vm14, %vm465_vm13 }
 0x13a   : >> { %v571_v53 = vmul.f32 %v567_v39, %v2596_v28  ;;  %v722_v2 = vmul.f32 %v705_v49, %v694_v37  ;;  %v647_v30 = vmul.f32 -2.9910269, %v1796_v50  ;;  %v1786_v33 = vadd.f32 -0.33333334, %v2363_v20 }
 0x13b   : >> { %v623_v7 = vmul.f32 %v619_v1, %v2598_v13  ;;  %v631_v6 = vmul.f32 %v627_v17, %v551_v11  ;;  %v643_v22 = vmul.f32 %v639_v41, %v551_v11  ;;  %v473_v35 = vsel %vm469_vm9, 1.0, %v3371_v54 }
 0x13c   : >> { %v2609_v52 = vadd.f32 %v571_v53, %v559_v61  ;;  %v882_v39 = vmul.f32 %v2349_v10, %v862_v59  ;;  %v815_v51 = vmul.f32 -1.4977534, %v1796_v50  ;;  %v501_v63 = vmul.f32 -3.0, %v1786_v33  ;;  %v720_v10 = vpop.permute.xlu0 %719 }
 0x13d   : >> { %v533_v5 = vmul.f32 3.0, %v1786_v33  ;;  %v2613_v32 = vadd.f32 %v631_v6, %v623_v7  ;;  %v457_v1 = vsel %vm453_vm14, 0.0, %v3370_v24  ;;  %v509_v61 = vmul.f32 3.0, %v2363_v20 }
 0x13e   : >> { %v651_v37 = vmul.f32 %v647_v30, %v2609_v52  ;;  %v2620_v49 = vmul.f32 %v501_v63, %v457_v1  ;;  %v649_v11 = vmul.f32 -2.9910269, %v2446_v45  ;;  %v661_v59 = vmul.f32 2.9910269, %v2440_v38  ;;  %v960_v30 = vpop.permute.xlu1 %959 }
 0x13f   : >> { %v537_v41 = vmul.f32 %v533_v5, %v473_v35  ;;  %v521_v53 = vmul.f32 -3.0, %v2440_v38  ;;  %v589_v17 = vmul.f32 -2.9910269, %v1786_v33  ;;  %v641_v7 = vmul.f32 1.5, %v1786_v33 }
 0x140   : >> { %v2624_v50 = vadd.f32 %v651_v37, %v643_v22  ;;  %v653_v24 = vmul.f32 %v649_v11, %v2502_v34  ;;  %v665_v63 = vmul.f32 %v661_v59, %v2502_v34  ;;  %v1810_v5 = vadd.f32 0.0015, %v2363_v20 }
 0x141   : >> { %v2628_v6 = vadd.f32 %v2479_v14, %v537_v41  ;;  %v2634_v54 = vmul.f32 %v960_v30, %v2523_v0  ;;  %v2638_v22 = vmul.f32 %v2539_v31, %v2494_v27  ;;  %v2641_v37 = vmul.f32 %v730_v43, %v2545_v57  ;;  %v2657_v43 = vpop.permute.xlu0 %755 }
 0x142   : >> { %v2643_v45 = vadd.f32 %v882_v39, %v722_v2  ;;  %v811_v14 = vmul.f32 %v2613_v32, %v2471_v47  ;;  %v819_v41 = vmul.f32 %v815_v51, %v2624_v50  ;;  %v593_v34 = vmul.f32 %v589_v17, %v2620_v49 }
 0x143   : >> { %v645_v11 = vmul.f32 %v641_v7, %v2628_v6  ;;  %v2650_v0 = vmul.f32 %v509_v61, %v457_v1  ;;  %v2653_v59 = vadd.f32 %v2520_v62, %v665_v63  ;;  %v640_v31 = vmul.f32 1.5, %v2377_v25 }
 0x144   : >> { %3372 = vst [vmem:[#allocation23_spill] sm:$0xff] %v2643_v45  ;;  %v648_v27 = vmul.f32 -2.9910269, %v2384_v29  ;;  %v2659_v57 = vmul.f32 %v521_v53, %v473_v35  ;;  %v693_v39 = vmul.f32 -2.9865606, %v1786_v33  ;;  %v2666_v61 = vadd.f32 %v819_v41, %v811_v14 }
 0x145   : >> { %v2661_v2 = vadd.f32 %v653_v24, %v645_v11  ;;  %v733_v51 = vmul.f32 2.9865606, %v1810_v5  ;;  %v849_v17 = vmul.f32 1.4977534, %v1786_v33  ;;  %v857_v7 = vmul.f32 -2.9865606, %v2465_v3 }
 0x146   : >> { %v644_v1 = vmul.f32 %v640_v31, %v2405_v58  ;;  %v652_v62 = vmul.f32 %v648_v27, %v2407_v60  ;;  %v697_v30 = vmul.f32 %v693_v39, %v593_v34  ;;  %v499_v63 = vmul.f32 -3.0, %v2550_v56  ;;  %v2686_v27 = vpop.permute.xlu0 %791 }
 0x147   : >> { %v579_v45 = vmul.f32 1000.0, %v2577_v55  ;;  %v853_v35 = vmul.f32 %v849_v17, %v2661_v2  ;;  %v861_v24 = vmul.f32 %v857_v7, %v2653_v59  ;;  %v2673_v53 = vadd.f32 0.001, %v2471_v47 }
 0x148   : >> { %v607_v3 = vmul.f32 -1.5, %v2564_v46  ;;  %v503_v58 = vmul.f32 %v499_v63, %v2570_v48  ;;  %v659_v33 = vmul.f32 2.9910269, %v2564_v46  ;;  %v2680_v5 = vadd.f32 -1.0015, %v2471_v47 }
 0x149   : >> { %v583_v60 = vmul.f32 %v579_v45, %v2596_v28  ;;  %v2682_v14 = vmul.f32 %v733_v51, %v593_v34  ;;  %v656_v41 = vadd.f32 %v652_v62, %v644_v1  ;;  %v599_v11 = vmul.f32 2.9910269, %v2673_v53 }
 0x14a   : >> { %v611_v31 = vmul.f32 %v607_v3, %v2598_v13  ;;  %v725_v39 = vmul.f32 %v720_v10, %v697_v30  ;;  %v812_v48 = vmul.f32 %v2421_v16, %v2358_v18  ;;  %v663_v45 = vmul.f32 %v659_v33, %v2609_v52  ;;  %v2708_v33 = vpop.permute.xlu1 %831 }
 0x14b   : >> { %v671_v28 = vmul.f32 -666.6667, %v2680_v5  ;;  %v865_v17 = vadd.f32 %v861_v24, %v853_v35  ;;  %v816_v7 = vmul.f32 -1.4977534, %v2384_v29  ;;  %v587_v34 = vmul.f32 -2.9910269, %v2550_v56 }
 0x14c   : >> { %v603_v51 = vmul.f32 %v599_v11, %v503_v58  ;;  %v848_v1 = vmul.f32 1.4977534, %v2377_v25  ;;  %v683_v13 = vmul.f32 666.6667, %v2577_v55  ;;  %v1808_v10 = vadd.f32 0.0015, %v2471_v47 }
 0x14d   : >> { %v675_v62 = vmul.f32 %v671_v28, %v583_v60  ;;  %v820_v30 = vmul.f32 %v816_v7, %v656_v41  ;;  %v2697_v63 = vmul.f32 %v587_v34, %v503_v58  ;;  %v739_v52 = vmul.f32 -1.4977534, %v2564_v46  ;;  %v2713_v7 = vpop.permute.xlu0 %803 }
 0x14e   : >> { %v2699_v16 = vadd.f32 %v611_v31, %v603_v51  ;;  %v2704_v29 = vmul.f32 %v683_v13, %v583_v60  ;;  %v891_v24 = vmul.f32 2.9865606, %v2564_v46  ;;  %v1812_v3 = vadd.f32 -1.002, %v2471_v47 }
 0x14f   : >> { %v2702_v35 = vadd.f32 %v675_v62, %v663_v45  ;;  %v885_v11 = vmul.f32 %v2360_v19, %v865_v17  ;;  %v852_v28 = vmul.f32 %v848_v1, %v656_v41  ;;  %v588_v58 = vmul.f32 -2.9910269, %v2377_v25 }
 0x150   : >> { %v1809_v31 = vadd.f32 0.0015, %v2358_v18  ;;  %v731_v34 = vmul.f32 2.9865606, %v1808_v10  ;;  %v743_v45 = vmul.f32 %v739_v52, %v2699_v16  ;;  %v903_v51 = vmul.f32 -500.0, %v1812_v3  ;;  %v836_v3 = vpop.permute.xlu1 %835 }
 0x151   : >> { %v895_v60 = vmul.f32 %v891_v24, %v2702_v35  ;;  %v824_v46 = vadd.f32 %v820_v30, %v812_v48  ;;  %v592_v47 = vmul.f32 %v588_v58, %v2401_v44  ;;  %v740_v62 = vmul.f32 -1.4977534, %v2380_v26  ;;  %v2728_v30 = vpop.permute.xlu0 %871 }
 0x152   : >> { %v856_v19 = vmul.f32 -2.9865606, %v2414_v4  ;;  %v735_v41 = vmul.f32 %v731_v34, %v2697_v63  ;;  %v907_v17 = vmul.f32 %v903_v51, %v2704_v29  ;;  %v692_v18 = vmul.f32 -2.9865606, %v2377_v25 }
 0x153   : >> { %v526_v1 = vadd.f32 %v2638_v22, %v2536_v42  ;;  %v732_v13 = vmul.f32 2.9865606, %v1809_v31  ;;  %v744_v10 = vmul.f32 %v740_v62, %v2417_v8  ;;  %v1799_v44 = vadd.f32 0.001, %v2449_v40 }
 0x154   : >> { %v860_v48 = vmul.f32 %v856_v19, %v2435_v36  ;;  %v747_v26 = vadd.f32 %v743_v45, %v735_v41  ;;  %v911_v4 = vadd.f32 %v907_v17, %v895_v60  ;;  %v606_v52 = vmul.f32 -1.5, %v2485_v21 }
 0x155   : >> { %v618_v24 = vmul.f32 1.5, %v2449_v40  ;;  %v696_v25 = vmul.f32 %v692_v18, %v592_v47  ;;  %v736_v58 = vmul.f32 %v732_v13, %v592_v47  ;;  %v598_v34 = vmul.f32 2.9910269, %v1799_v44  ;;  %v3373_v47 = vld [vmem:[#allocation12_spill] sm:$0xff]  ;;  %v3374_v18 = vld [vmem:[#allocation17_spill] sm:$0xff] }
 0x156   : >> { %v626_v42 = vmul.f32 -1.5, %v2488_v15  ;;  %v844_v22 = vmul.f32 %v836_v3, %v824_v46  ;;  %v864_v8 = vadd.f32 %v860_v48, %v852_v28  ;;  %v610_v31 = vmul.f32 %v606_v52, %v526_v1  ;;  %v3375_v13 = vld [vmem:[#allocation13_spill] sm:$0xff]  ;;  %v3376_v28 = vld [vmem:[#allocation6_spill] sm:$0xff] }
 0x157   : >> { %v622_v36 = vmul.f32 %v618_v24, %v526_v1  ;;  %v2733_v51 = vadd.f32 %v885_v11, %v725_v39  ;;  %v748_v62 = vadd.f32 %v744_v10, %v736_v58  ;;  %v602_v45 = vmul.f32 %v598_v34, %v2528_v12  ;;  %v2748_v12 = vpop.permute.xlu0 %915 }
 0x158   : >> { %v630_v60 = vmul.f32 %v626_v42, %v2530_v9  ;;  %v2738_v19 = vadd.f32 %v2490_v23, %v844_v22  ;;  %v767_v41 = vmul.f32 %v2657_v43, %v747_v26  ;;  %v931_v17 = vmul.f32 %v3373_v47, %v911_v4  ;;  %v3377_v9 = vld [vmem:[#allocation11_spill] sm:$0xff]  ;;  %v3378_v4 = vld [vmem:[#allocation8_spill] sm:$0xff] }
 0x159   : >> { %v932_v46 = vmul.f32 %v3375_v13, %v3374_v18  ;;  %v724_v48 = vmul.f32 %v3376_v28, %v696_v25  ;;  %v614_v1 = vadd.f32 %v610_v31, %v602_v45  ;;  %v682_v11 = vmul.f32 666.6667, %v2488_v15  ;;  %v3379_v22 = vld [vmem:[#allocation15_spill] sm:$0xff]  ;;  %v3380_v31 = vld [vmem:[#allocation20_spill] sm:$0xff] }
 0x15a   : >> { %v2745_v39 = vadd.f32 %v630_v60, %v622_v36  ;;  %v884_v10 = vmul.f32 %v3377_v9, %v864_v8  ;;  %v529_v23 = vadd.f32 %v2659_v57, %v2650_v0  ;;  %v1802_v43 = vadd.f32 0.001, %v2363_v20 }
 0x15b   : >> { %v609_v26 = vmul.f32 -1.5, %v2440_v38  ;;  %v768_v52 = vmul.f32 %v3378_v4, %v748_v62  ;;  %v770_v24 = vmul.f32 1.4977534, %v1799_v44  ;;  %v778_v3 = vmul.f32 -1.0, %v2488_v15  ;;  %v928_v28 = vpop.permute.xlu0 %927 }
 0x15c   : >> { %v621_v25 = vmul.f32 1.5, %v2363_v20  ;;  %v2758_v58 = vadd.f32 %v931_v17, %v767_v41  ;;  %v601_v34 = vmul.f32 2.9910269, %v1802_v43  ;;  %v629_v8 = vmul.f32 -1.5, %v3379_v22 }
 0x15d   : >> { %v613_v42 = vmul.f32 %v609_v26, %v529_v23  ;;  %v686_v36 = vmul.f32 %v682_v11, %v3380_v31  ;;  %v774_v0 = vmul.f32 %v770_v24, %v614_v1  ;;  %v782_v57 = vmul.f32 %v778_v3, %v2745_v39 }
 0x15e   : >> { %v625_v45 = vmul.f32 %v621_v25, %v529_v23  ;;  %v2763_v60 = vadd.f32 %v884_v10, %v724_v48  ;;  %v605_v44 = vmul.f32 %v601_v34, %v2620_v49  ;;  %v633_v62 = vmul.f32 %v629_v8, %v2628_v6  ;;  %v3381_v8 = vld [vmem:[#allocation22_spill] sm:$0xff] }
 0x15f   : >> { %v773_v47 = vmul.f32 1.4977534, %v1802_v43  ;;  %v938_v41 = vmul.f32 500.0, %v2488_v15  ;;  %v781_v17 = vmul.f32 -1.0, %v3379_v22  ;;  %v691_v18 = vmul.f32 -2.9865606, %v2550_v56  ;;  %v952_v34 = vpop.permute.xlu0 %951 }
 0x160   : >> { %v847_v13 = vmul.f32 1.4977534, %v2550_v56  ;;  %v617_v11 = vadd.f32 %v613_v42, %v605_v44  ;;  %v637_v9 = vadd.f32 %v633_v62, %v625_v45  ;;  %v855_v23 = vmul.f32 -2.9865606, %v2680_v5 }
 0x161   : >> { %v738_v48 = vmul.f32 -1.4977534, %v2485_v21  ;;  %v786_v10 = vadd.f32 %v782_v57, %v774_v0  ;;  %v695_v49 = vmul.f32 %v691_v18, %v2697_v63  ;;  %v890_v15 = vmul.f32 2.9865606, %v2485_v21  ;;  %v3383_v18 = vld [vmem:[#allocation7_spill] sm:$0xff] }
 0x162   : >> { %v851_v6 = vmul.f32 %v847_v13, %v2624_v50  ;;  %v777_v43 = vmul.f32 %v773_v47, %v617_v11  ;;  %v785_v26 = vmul.f32 %v781_v17, %v637_v9  ;;  %v859_v4 = vmul.f32 %v855_v23, %v2702_v35 }
 0x163   : >> { %v742_v24 = vmul.f32 %v738_v48, %v614_v1  ;;  %v936_v56 = vadd.f32 %v932_v46, %v768_v52  ;;  %v942_v3 = vmul.f32 %v938_v41, %v686_v36  ;;  %v1811_v25 = vadd.f32 -1.002, %v2449_v40  ;;  %v3382_v52 = vld [vmem:[#allocation5_spill] sm:$0xff]  ;;  %v828_v48 = vpop.permute.xlu0 %827 }
 0x164   : >> { %v741_v5 = vmul.f32 -1.4977534, %v2440_v38  ;;  %v789_v42 = vadd.f32 %v785_v26, %v777_v43  ;;  %v863_v22 = vadd.f32 %v859_v4, %v851_v6  ;;  %v894_v50 = vmul.f32 %v890_v15, %v3381_v8  ;;  %v3387_v43 = vld [vmem:[#allocation16_spill] sm:$0xff]  ;;  %v3388_v4 = vld [vmem:[#allocation14_spill] sm:$0xff] }
 0x165   : >> { %v746_v63 = vadd.f32 %v742_v24, %v2641_v37  ;;  %v902_v31 = vmul.f32 -500.0, %v1811_v25  ;;  %v893_v0 = vmul.f32 2.9865606, %v2440_v38  ;;  %v1814_v35 = vadd.f32 -1.002, %v2363_v20  ;;  %v3390_v8 = vld [vmem:[#allocation10_spill] sm:$0xff] }
 0x166   : >> { %v745_v21 = vmul.f32 %v741_v5, %v617_v11  ;;  %v806_v46 = vmul.f32 %v2686_v27, %v786_v10  ;;  %v809_v1 = vmul.f32 %v2713_v7, %v789_v42  ;;  %v723_v57 = vmul.f32 %v3382_v52, %v695_v49  ;;  %v3384_v11 = vld [vmem:[#allocation9_spill] sm:$0xff]  ;;  %v3391_v52 = vld [vmem:[#allocation23_spill] sm:$0xff] }
 0x167   : >> { %v771_v45 = vmul.f32 1.4977534, %v2673_v53  ;;  %v906_v44 = vmul.f32 %v902_v31, %v686_v36  ;;  %v897_v37 = vmul.f32 %v893_v0, %v2653_v59  ;;  %v905_v47 = vmul.f32 -500.0, %v1814_v35  ;;  %v3385_v53 = vld [vmem:[#allocation19_spill] sm:$0xff]  ;;  %v3389_v42 = vld [vmem:[#allocation21_spill] sm:$0xff] }
 0x168   : >> { %v749_v62 = vadd.f32 %v745_v21, %v2682_v14  ;;  %v883_v41 = vmul.f32 %v2728_v30, %v863_v22  ;;  %v779_v17 = vmul.f32 -1.0, %v2577_v55  ;;  %v939_v27 = vmul.f32 500.0, %v2577_v55  ;;  %v989_v14 = vpop.permute.xlu1 %988  ;;  %v3386_v30 = vld [vmem:[#allocation18_spill] sm:$0xff]  ;;  %v840_v21 = vpop.permute.xlu0 %839 }
 0x169   : >> { %v775_v38 = vmul.f32 %v771_v45, %v2699_v16  ;;  %v766_v7 = vmul.f32 %v3383_v18, %v746_v63  ;;  %v910_v13 = vadd.f32 %v906_v44, %v894_v50  ;;  %v909_v36 = vmul.f32 %v905_v47, %v3385_v53 }
 0x16a   : >> { %v769_v23 = vmul.f32 %v3384_v11, %v749_v62  ;;  %v783_v59 = vmul.f32 %v779_v17, %v2613_v32  ;;  %v943_v10 = vmul.f32 %v939_v27, %v2704_v29  ;;  %v810_v16 = vmul.f32 %v2745_v39, %v2449_v40 }
 0x16b   : >> { %v814_v49 = vmul.f32 -1.4977534, %v3386_v30  ;;  %v930_v55 = vmul.f32 %v2748_v12, %v910_v13  ;;  %v913_v6 = vadd.f32 %v909_v36, %v897_v37  ;;  %v813_v15 = vmul.f32 %v637_v9, %v2363_v20 }
 0x16c   : >> { %v817_v26 = vmul.f32 -1.4977534, %v3387_v43  ;;  %v962_v24 = vmul.f32 %v3388_v4, %v942_v3  ;;  %v887_v25 = vadd.f32 %v883_v41, %v723_v57  ;;  %v787_v5 = vadd.f32 %v783_v59, %v775_v38  ;;  %v999_v35 = vpop.permute.xlu1 %998 }
 0x16d   : >> { %v818_v32 = vmul.f32 %v814_v49, %v3389_v42  ;;  %v976_v29 = vadd.f32 %v936_v56, %v2763_v60  ;;  %v934_v22 = vadd.f32 %v930_v55, %v766_v7  ;;  %v933_v63 = vmul.f32 %v928_v28, %v913_v6 }
 0x16e   : >> { %v821_v40 = vmul.f32 %v817_v26, %v2661_v2  ;;  %v966_v39 = vadd.f32 %v962_v24, %v806_v46  ;;  %v807_v12 = vmul.f32 %v3390_v8, %v787_v5  ;;  %v963_v50 = vmul.f32 %v952_v34, %v943_v10 }
 0x16f   : >> { %v822_v31 = vadd.f32 %v818_v32, %v810_v16  ;;  %v843_v20 = vmul.f32 %v2708_v33, %v2666_v61  ;;  %v969_v9 = vadd.f32 %v2634_v54, %v809_v1  ;;  %v937_v3 = vadd.f32 %v933_v63, %v769_v23  ;;  %v994_v33 = vpop.permute.xlu0 %993 }
 0x170   : >> { %v825_v0 = vadd.f32 %v821_v40, %v813_v15  ;;  %v974_v60 = vadd.f32 %v934_v22, %v3391_v52  ;;  %v967_v56 = vadd.f32 %v963_v50, %v807_v12  ;;  %v975_v2 = vadd.f32 %v2758_v58, %v887_v25  ;;  %v1004_v47 = vpop.permute.xlu1 %1003 }
 0x171   : >> { %v842_v28 = vmul.f32 %v828_v48, %v822_v31  ;;  %v984_v46 = vadd.f32 %v2738_v19, %v976_v29  ;;  %v977_v34 = vadd.f32 %v937_v3, %v2733_v51  ;;  %vm2079_vm15 = vmmov 0  }
 0x172   : >> { %v845_v57 = vmul.f32 %v840_v21, %v825_v0  ;;  %v979_v44 = vadd.f32 %v967_v56, %v843_v20  ;;  %v3392_v15 = vmov 0.0   ;;  %v3394_v52 = vmov 1.0  }
 0x173   : >> { %v978_v45 = vadd.f32 %v966_v39, %v842_v28  ;;  %v1008_v62 = vadd.f32 %v999_v35, %v984_v46  ;;  %1885 = vmatprep.mubr.msk.f32.mxu1 %vm2079_vm15, %v3392_v15 }
 0x174   : >> { %v981_v61 = vadd.f32 %v969_v9, %v845_v57  ;;  %v983_v1 = vadd.f32 %v979_v44, %v975_v2  ;;  %v2831_v6 = vpop.permute.xlu1 %1354 }
 0x175   : >> { %v982_v54 = vadd.f32 %v978_v45, %v974_v60 }
 0x176   : >> { %v985_v37 = vadd.f32 %v981_v61, %v977_v34  ;;  %v2818_v38 = vadd.f32 %v994_v33, %v983_v1 }
 0x177   : >> { %v2816_v41 = vadd.f32 %v989_v14, %v982_v54 }
 0x178   : >> { %v2820_v17 = vadd.f32 %v1004_v47, %v985_v37  ;;  %v2834_v43 = vpop.permute.xlu1 %1394 }
 0x179   : >> { %v1010_v19 = vmin.f32 %v2816_v41, %v2818_v38  ;;  %v1019_v51 = vmax.f32 %v2816_v41, %v2818_v38 }
 0x17a   : >> { %v1011_v58 = vmin.f32 %v1008_v62, %v2820_v17  ;;  %v1020_v27 = vmax.f32 %v1008_v62, %v2820_v17 }
 0x17c   : >> { %v1012_v18 = vmin.f32 %v1010_v19, %v1011_v58  ;;  %v1021_v7 = vmax.f32 %v1019_v51, %v1020_v27  ;;  %v2836_v25 = vpop.permute.xlu1 %1518 }
 0x17e   : >> { %v1013_v13 = vrot.slane %v1012_v18, 4  ;;  %v1022_v11 = vrot.slane %v1021_v7, 4 }
 0x180   : >> { %v1014_v23 = vmin.f32 %v1012_v18, %v1013_v13  ;;  %v1023_v53 = vmax.f32 %v1021_v7, %v1022_v11  ;;  %v2850_v22 = vpop.permute.xlu1 %1550 }
 0x181   : >> { %3393 = vst [vmem:[#allocation12_spill] sm:$0xff] %v2850_v22 }
 0x182   : >> { %v1015_v36 = vrot.slane %v1014_v23, 2  ;;  %v1024_v48 = vrot.slane %v1023_v53, 2 }
 0x184   : >> { %v1016_v14 = vmin.f32 %v1014_v23, %v1015_v36  ;;  %v1025_v59 = vmax.f32 %v1023_v53, %v1024_v48  ;;  %v2887_v34 = vpop.permute.xlu1 %1350 }
 0x186   : >> { %v1017_v10 = vrot.slane %v1016_v14, 1  ;;  %v1026_v16 = vrot.slane %v1025_v59, 1 }
 0x188   : >> { %v2828_v30 = vmin.f32 %v1016_v14, %v1017_v10  ;;  %v1027_v49 = vmax.f32 %v1025_v59, %v1026_v16  ;;  %v2914_v14 = vpop.permute.xlu1 %1390 }
 0x18a   : >> { %v1028_v55 = vsub.f32 %v1027_v49, %v2828_v30  ;;  %v1035_v42 = vsub.f32 %v1008_v62, %v2828_v30  ;;  %v1034_v20 = vsub.f32 %v2818_v38, %v2828_v30  ;;  %v1036_v57 = vsub.f32 %v2820_v17, %v2828_v30 }
 0x18c   : >> { %1996 = vrcp.f32 %v1028_v55 }
 0x199   : >> { %v1997_v26 = vpop.eup %1996 }
 0x19a   : >> { %v1030_v4 = vmul.f32 %v1997_v26, %v1028_v55 }
 0x19c   : >> { %v1031_v24 = vsub.f32 2.0, %v1030_v4 }
 0x19e   : >> { %v2838_v5 = vmul.f32 %v1997_v26, %v1031_v24 }
 0x1a0   : >> { %v2842_v32 = vmul.f32 %v1035_v42, %v2838_v5  ;;  %v2901_v17 = vmul.f32 %v1034_v20, %v2838_v5  ;;  %v2910_v23 = vmul.f32 %v1036_v57, %v2838_v5 }
 0x1a2   : >> { %vm1043_vm0 = vcmp.ge.f32.partialorder %v2842_v32, 0.33333334  ;;  %vm1051_vm1 = vcmp.ge.f32.partialorder %v2842_v32, 0.6666667  ;;  %vm1067_vm2 = vcmp.ge.f32.partialorder %v2842_v32, 1.0  ;;  %v2848_v29 = vadd.f32 -1.0, %v2842_v32 }
 0x1a3   : >> { %vm1055_vm3 = vmxor %vm1051_vm1, %vm2078_vm4  ;;  %v2856_v63 = vadd.f32 -0.33333334, %v2842_v32  ;;  %v2859_v40 = vadd.f32 -0.6666667, %v2842_v32  ;;  %v2865_v8 = vadd.f32 -1.001, %v2842_v32 }
 0x1a4   : >> { %vm1059_vm5 = vmand %vm1043_vm0, %vm1055_vm3  ;;  %v1135_v39 = vmul.f32 -3.0, %v2848_v29  ;;  %v1171_v3 = vmul.f32 1000.0, %v2848_v29  ;;  %v1083_v0 = vsel %vm1067_vm2, 1.0, %v3392_v15  ;;  %v1047_v60 = vsel %vm1043_vm0, 0.0, %v3394_v52 }
 0x1a5   : >> { %v1063_v12 = vsel %vm1059_vm5, 1.0, %v3392_v15  ;;  %vm1071_vm6 = vmxor %vm1067_vm2, %vm2078_vm4  ;;  %v1123_v50 = vmul.f32 3.0, %v2856_v63  ;;  %v1147_v31 = vmul.f32 3.0, %v2859_v40  ;;  %v1159_v9 = vmul.f32 -1000.0, %v2865_v8 }
 0x1a6   : >> { %vm1075_vm7 = vmand %vm1051_vm1, %vm1071_vm6  ;;  %v1837_v46 = vadd.f32 -1.0015, %v2842_v32  ;;  %v1091_v45 = vmul.f32 -3.0, %v2856_v63  ;;  %v1099_v44 = vmul.f32 3.0, %v2842_v32  ;;  %v1111_v61 = vmul.f32 -3.0, %v2859_v40 }
 0x1a7   : >> { %v1079_v21 = vsel %vm1075_vm7, 1.0, %v3392_v15  ;;  %v1127_v35 = vmul.f32 %v1123_v50, %v1063_v12  ;;  %v1163_v2 = vmul.f32 %v1159_v9, %v1083_v0  ;;  %v1175_v1 = vmul.f32 %v1171_v3, %v1083_v0 }
 0x1a8   : >> { %v1139_v56 = vmul.f32 %v1135_v39, %v1079_v21  ;;  %v1151_v28 = vmul.f32 %v1147_v31, %v1079_v21  ;;  %v2897_v62 = vadd.f32 0.001, %v2842_v32  ;;  %v1251_v37 = vmul.f32 2.9910269, %v2859_v40 }
 0x1a9   : >> { %v1095_v47 = vmul.f32 %v1091_v45, %v1047_v60  ;;  %v1103_v38 = vmul.f32 %v1099_v44, %v1047_v60  ;;  %v1115_v19 = vmul.f32 %v1111_v61, %v1063_v12  ;;  %v1231_v51 = vmul.f32 1.5, %v2856_v63 }
 0x1aa   : >> { %v2894_v33 = vadd.f32 %v1139_v56, %v1127_v35  ;;  %v1167_v54 = vadd.f32 %v1163_v2, %v1151_v28  ;;  %v1239_v58 = vmul.f32 -2.9910269, %v2865_v8  ;;  %v1263_v27 = vmul.f32 -666.6667, %v1837_v46  ;;  %v1467_v2 = vpop.permute.xlu1 %1466 }
 0x1ab   : >> { %v2905_v7 = vadd.f32 %v1115_v19, %v1103_v38  ;;  %v1191_v13 = vmul.f32 2.9910269, %v2897_v62  ;;  %v1199_v11 = vmul.f32 -1.5, %v2859_v40  ;;  %v1179_v48 = vmul.f32 -2.9910269, %v2856_v63 }
 0x1ac   : >> { %v1255_v18 = vmul.f32 %v1251_v37, %v1167_v54  ;;  %v1235_v53 = vmul.f32 %v1231_v51, %v2894_v33  ;;  %v1243_v36 = vmul.f32 %v1239_v58, %v1167_v54  ;;  %v1267_v59 = vmul.f32 %v1263_v27, %v1175_v1 }
 0x1ad   : >> { %v1439_v10 = vmul.f32 1.4977534, %v2856_v63  ;;  %v1195_v16 = vmul.f32 %v1191_v13, %v1095_v47  ;;  %v1203_v49 = vmul.f32 %v1199_v11, %v2905_v7  ;;  %v1447_v55 = vmul.f32 -2.9865606, %v1837_v46 }
 0x1ae   : >> { %v2918_v26 = vmul.f32 %v1179_v48, %v1095_v47  ;;  %v1275_v4 = vmul.f32 666.6667, %v2848_v29  ;;  %v1841_v24 = vadd.f32 0.0015, %v2842_v32  ;;  %v1271_v42 = vadd.f32 %v1267_v59, %v1255_v18  ;;  %v1515_v48 = vpop.permute.xlu1 %1514 }
 0x1af   : >> { %v2922_v39 = vadd.f32 %v1203_v49, %v1195_v16  ;;  %v1845_v12 = vadd.f32 -1.002, %v2842_v32  ;;  %vm1042_vm8 = vcmp.ge.f32.partialorder %v2901_v17, 0.33333334  ;;  %v2926_v50 = vadd.f32 %v1243_v36, %v1235_v53 }
 0x1b0   : >> { %v1331_v31 = vmul.f32 -1.4977534, %v2859_v40  ;;  %vm1050_vm10 = vcmp.ge.f32.partialorder %v2901_v17, 0.6666667  ;;  %v2931_v20 = vadd.f32 -0.33333334, %v2901_v17  ;;  %v2933_v9 = vmul.f32 %v1275_v4, %v1175_v1 }
 0x1b1   : >> { %v1483_v3 = vmul.f32 2.9865606, %v2859_v40  ;;  %vm1054_vm11 = vmxor %vm1050_vm10, %vm2078_vm4  ;;  %v1098_v21 = vmul.f32 3.0, %v2901_v17  ;;  %v2941_v0 = vadd.f32 -0.6666667, %v2901_v17  ;;  %v1046_v56 = vsel %vm1042_vm8, 0.0, %v3394_v52 }
 0x1b2   : >> { %v1323_v35 = vmul.f32 2.9865606, %v1841_v24  ;;  %v1335_v60 = vmul.f32 %v1331_v31, %v2922_v39  ;;  %vm1058_vm12 = vmand %vm1042_vm8, %vm1054_vm11  ;;  %v1090_v28 = vmul.f32 -3.0, %v2931_v20  ;;  %v1495_v40 = vmul.f32 -500.0, %v1845_v12 }
 0x1b3   : >> { %v1487_v46 = vmul.f32 %v1483_v3, %v1271_v42  ;;  %v1062_v57 = vsel %vm1058_vm12, 1.0, %v3392_v15  ;;  %v1110_v45 = vmul.f32 -3.0, %v2941_v0  ;;  %v1443_v44 = vmul.f32 %v1439_v10, %v2926_v50 }
 0x1b4   : >> { %v1451_v61 = vmul.f32 %v1447_v55, %v1271_v42  ;;  %v1327_v54 = vmul.f32 %v1323_v35, %v2918_v26  ;;  %v2951_v1 = vadd.f32 0.001, %v2901_v17  ;;  %v1499_v37 = vmul.f32 %v1495_v40, %v2933_v9 }
 0x1b5   : >> { %v1102_v47 = vmul.f32 %v1098_v21, %v1046_v56  ;;  %v1114_v38 = vmul.f32 %v1110_v45, %v1062_v57  ;;  %v1094_v51 = vmul.f32 %v1090_v28, %v1046_v56  ;;  %v1033_v58 = vsub.f32 %v2816_v41, %v2828_v30 }
 0x1b6   : >> { %v1339_v19 = vadd.f32 %v1335_v60, %v1327_v54  ;;  %v1503_v27 = vadd.f32 %v1499_v37, %v1487_v46  ;;  %v1198_v13 = vmul.f32 -1.5, %v2941_v0  ;;  %v1455_v11 = vadd.f32 %v1451_v61, %v1443_v44  ;;  %v1301_v54 = vpop.permute.xlu1 %1300 }
 0x1b7   : >> { %v2956_v18 = vadd.f32 %v1114_v38, %v1102_v47  ;;  %v1122_v53 = vmul.f32 3.0, %v2931_v20  ;;  %v1190_v36 = vmul.f32 2.9910269, %v2951_v1  ;;  %vm1044_vm13 = vcmp.ge.f32.partialorder %v2910_v23, 0.33333334 }
 0x1b8   : >> { %v1178_v59 = vmul.f32 -2.9910269, %v2931_v20  ;;  %vm1052_vm14 = vcmp.ge.f32.partialorder %v2910_v23, 0.6666667  ;;  %v2966_v41 = vadd.f32 -0.33333334, %v2910_v23  ;;  %v1359_v30 = vmul.f32 %v2887_v34, %v1339_v19 }
 0x1b9   : >> { %v1202_v10 = vmul.f32 %v1198_v13, %v2956_v18  ;;  %v1194_v16 = vmul.f32 %v1190_v36, %v1094_v51  ;;  %vm1056_vm9 = vmxor %vm1052_vm14, %vm2078_vm4  ;;  %v1100_v49 = vmul.f32 3.0, %v2910_v23  ;;  %v2974_v55 = vadd.f32 -0.6666667, %v2910_v23 }
 0x1ba   : >> { %v1523_v4 = vmul.f32 %v1515_v48, %v1503_v27  ;;  %v1840_v24 = vadd.f32 0.0015, %v2901_v17  ;;  %v1048_v42 = vsel %vm1044_vm13, 0.0, %v3394_v52  ;;  %vm1060_vm15 = vmand %vm1044_vm13, %vm1056_vm9  ;;  %v1092_v12 = vmul.f32 -3.0, %v2966_v41 }
 0x1bb   : >> { %v2979_v31 = vadd.f32 %v1202_v10, %v1194_v16  ;;  %v1064_v34 = vsel %vm1060_vm15, 1.0, %v3392_v15  ;;  %v1112_v3 = vmul.f32 -3.0, %v2974_v55  ;;  %v2984_v21 = vadd.f32 0.001, %v2910_v23 }
 0x1bc   : >> { %v2987_v35 = vmul.f32 %v1033_v58, %v2838_v5  ;;  %v2989_v60 = vmul.f32 %v1467_v2, %v1455_v11  ;;  %v1126_v56 = vmul.f32 %v1122_v53, %v1062_v57  ;;  %v1182_v28 = vmul.f32 %v1178_v59, %v1094_v51 }
 0x1bd   : >> { %v1330_v46 = vmul.f32 -1.4977534, %v2941_v0  ;;  %v1096_v40 = vmul.f32 %v1092_v12, %v1048_v42  ;;  %v1104_v45 = vmul.f32 %v1100_v49, %v1048_v42  ;;  %v1116_v44 = vmul.f32 %v1112_v3, %v1064_v34  ;;  %v1347_v42 = vpop.permute.xlu1 %1346 }
 0x1be   : >> { %v2992_v61 = vadd.f32 %v1523_v4, %v1359_v30  ;;  %v1282_v37 = vmul.f32 -2.9865606, %v2931_v20  ;;  %v1322_v47 = vmul.f32 2.9865606, %v1840_v24  ;;  %v1180_v38 = vmul.f32 -2.9910269, %v2966_v41 }
 0x1bf   : >> { %v1334_v5 = vmul.f32 %v1330_v46, %v2979_v31  ;;  %v2997_v19 = vadd.f32 %v1116_v44, %v1104_v45  ;;  %v1192_v2 = vmul.f32 2.9910269, %v2984_v21  ;;  %v1200_v57 = vmul.f32 -1.5, %v2974_v55 }
 0x1c0   : >> { %3395 = vst [vmem:[#allocation17_spill] sm:$0xff] %v2992_v61  ;;  %v1286_v51 = vmul.f32 %v1282_v37, %v1182_v28  ;;  %v1326_v58 = vmul.f32 %v1322_v47, %v1182_v28  ;;  %v1211_v27 = vmul.f32 1.5, %v2842_v32  ;;  %v1219_v13 = vmul.f32 -1.5, %v2848_v29 }
 0x1c1   : >> { %v1184_v11 = vmul.f32 %v1180_v38, %v1096_v40  ;;  %v1196_v53 = vmul.f32 %v1192_v2, %v1096_v40  ;;  %v1204_v36 = vmul.f32 %v1200_v57, %v2997_v19  ;;  %v1842_v48 = vadd.f32 0.0015, %v2910_v23 }
 0x1c2   : >> { %v1215_v59 = vmul.f32 %v1211_v27, %v2905_v7  ;;  %v1223_v10 = vmul.f32 %v1219_v13, %v2894_v33  ;;  %vm1066_vm0 = vcmp.ge.f32.partialorder %v2901_v17, 1.0  ;;  %v3009_v30 = vadd.f32 -1.0, %v2901_v17  ;;  %v1311_v7 = vpop.permute.xlu0 %1310 }
 0x1c3   : >> { %v1338_v16 = vadd.f32 %v1334_v5, %v1326_v58  ;;  %v1124_v49 = vmul.f32 3.0, %v2966_v41  ;;  %v1284_v4 = vmul.f32 -2.9865606, %v2966_v41  ;;  %v1332_v24 = vmul.f32 -1.4977534, %v2974_v55  ;;  %vm1070_vm1 = vmxor %vm1066_vm0, %vm2078_vm4 }
 0x1c4   : >> { %v3017_v12 = vadd.f32 %v1204_v36, %v1196_v53  ;;  %vm1074_vm2 = vmand %vm1050_vm10, %vm1070_vm1  ;;  %v1134_v33 = vmul.f32 -3.0, %v3009_v30  ;;  %v1146_v3 = vmul.f32 3.0, %v2941_v0  ;;  %v3024_v28 = vadd.f32 -1.001, %v2901_v17 }
 0x1c5   : >> { %v1288_v46 = vmul.f32 %v1284_v4, %v1184_v11  ;;  %v1324_v40 = vmul.f32 2.9865606, %v1842_v48  ;;  %v1283_v45 = vmul.f32 -2.9865606, %v2856_v63  ;;  %v1078_v44 = vsel %vm1074_vm2, 1.0, %v3392_v15 }
 0x1c6   : >> { %v1227_v37 = vadd.f32 %v1223_v10, %v1215_v59  ;;  %v1138_v47 = vmul.f32 %v1134_v33, %v1078_v44  ;;  %v1150_v38 = vmul.f32 %v1146_v3, %v1078_v44  ;;  %v1158_v5 = vmul.f32 -1000.0, %v3024_v28  ;;  %v1427_v10 = vpop.permute.xlu1 %1426  ;;  %v1306_v33 = vpop.permute.xlu0 %1305 }
 0x1c7   : >> { %v1407_v2 = vmul.f32 -1.4977534, %v2865_v8  ;;  %v1287_v57 = vmul.f32 %v1283_v45, %v2918_v26  ;;  %v1082_v58 = vsel %vm1066_vm0, 1.0, %v3392_v15  ;;  %v1170_v27 = vmul.f32 1000.0, %v3009_v30 }
 0x1c8   : >> { %v3035_v13 = vmul.f32 %v1301_v54, %v1286_v51  ;;  %v1336_v63 = vmul.f32 %v1332_v24, %v3017_v12  ;;  %v3038_v53 = vadd.f32 %v1138_v47, %v1126_v56  ;;  %v1162_v36 = vmul.f32 %v1158_v5, %v1082_v58 }
 0x1c9   : >> { %v3040_v48 = vmul.f32 %v1347_v42, %v1338_v16  ;;  %v3042_v59 = vmul.f32 %v1124_v49, %v1064_v34  ;;  %v1328_v8 = vmul.f32 %v1324_v40, %v1184_v11  ;;  %v1411_v26 = vmul.f32 %v1407_v2, %v2926_v50 }
 0x1ca   : >> { %v1403_v4 = vmul.f32 %v1227_v37, %v2842_v32  ;;  %v1166_v3 = vadd.f32 %v1162_v36, %v1150_v38  ;;  %v1230_v54 = vmul.f32 1.5, %v2931_v20  ;;  %v1836_v51 = vadd.f32 -1.0015, %v2901_v17 }
 0x1cb   : >> { %v3048_v24 = vmul.f32 %v1311_v7, %v1288_v46  ;;  %v1315_v56 = vmul.f32 %v1306_v33, %v1287_v57  ;;  %v1174_v45 = vmul.f32 %v1170_v27, %v1082_v58  ;;  %v1238_v16 = vmul.f32 -2.9910269, %v3024_v28 }
 0x1cc   : >> { %v3051_v34 = vadd.f32 %v1336_v63, %v1328_v8  ;;  %v1234_v11 = vmul.f32 %v1230_v54, %v3038_v53  ;;  %v1250_v50 = vmul.f32 2.9910269, %v2941_v0  ;;  %v1274_v32 = vmul.f32 666.6667, %v3009_v30 }
 0x1cd   : >> { %v1242_v49 = vmul.f32 %v1238_v16, %v1166_v3  ;;  %v1363_v42 = vmul.f32 1.4977534, %v2897_v62  ;;  %v1371_v40 = vmul.f32 -1.0, %v2848_v29  ;;  %vm1041_vm3 = vcmp.ge.f32.partialorder %v2987_v35, 0.33333334  ;;  %v3069_v62 = vpop.permute.xlu1 %1462 }
 0x1ce   : >> { %v1415_v7 = vadd.f32 %v1411_v26, %v1403_v4  ;;  %v1254_v46 = vmul.f32 %v1250_v50, %v1166_v3  ;;  %v1262_v44 = vmul.f32 -666.6667, %v1836_v51  ;;  %vm1049_vm5 = vcmp.ge.f32.partialorder %v2987_v35, 0.6666667 }
 0x1cf   : >> { %v3061_v47 = vadd.f32 %v2989_v60, %v1315_v56  ;;  %v3063_v38 = vmul.f32 %v1274_v32, %v1174_v45  ;;  %v1367_v5 = vmul.f32 %v1363_v42, %v2922_v39  ;;  %v1375_v2 = vmul.f32 %v1371_v40, %v1227_v37  ;;  %vm1053_vm6 = vmxor %vm1049_vm5, %vm2078_vm4  ;;  %v1547_v40 = vpop.permute.xlu0 %1546 }
 0x1d0   : >> { %v1266_v57 = vmul.f32 %v1262_v44, %v1174_v45  ;;  %v1530_v58 = vmul.f32 500.0, %v3009_v30  ;;  %vm1057_vm7 = vmand %vm1041_vm3, %vm1053_vm6  ;;  %v3075_v60 = vadd.f32 -0.33333334, %v2987_v35  ;;  %v3078_v27 = vadd.f32 -0.6666667, %v2987_v35 }
 0x1d1   : >> { %3396 = vst [vmem:[#allocation13_spill] sm:$0xff] %v3061_v47  ;;  %v3080_v39 = vadd.f32 %v1242_v49, %v1234_v11  ;;  %v1531_v37 = vmul.f32 500.0, %v2848_v29  ;;  %v1061_v63 = vsel %vm1057_vm7, 1.0, %v3392_v15  ;;  %v1097_v36 = vmul.f32 3.0, %v2987_v35  ;;  %v1543_v42 = vpop.permute.xlu1 %1542 }
 0x1d2   : >> { %v1270_v8 = vadd.f32 %v1266_v57, %v1254_v46  ;;  %v1438_v26 = vmul.f32 1.4977534, %v2931_v20  ;;  %v1045_v4 = vsel %vm1041_vm3, 0.0, %v3394_v52  ;;  %v1109_v33 = vmul.f32 -3.0, %v3078_v27 }
 0x1d3   : >> { %v1446_v3 = vmul.f32 -2.9865606, %v1836_v51  ;;  %v1534_v54 = vmul.f32 %v1530_v58, %v3063_v38  ;;  %v1379_v56 = vadd.f32 %v1375_v2, %v1367_v5  ;;  %v1535_v45 = vmul.f32 %v1531_v37, %v2933_v9 }
 0x1d4   : >> { %v1089_v29 = vmul.f32 -3.0, %v3075_v60  ;;  %v1113_v16 = vmul.f32 %v1109_v33, %v1061_v63  ;;  %v1210_v11 = vmul.f32 1.5, %v2901_v17  ;;  %v1218_v50 = vmul.f32 -1.5, %v3009_v30 }
 0x1d5   : >> { %v3095_v20 = vmul.f32 %v1427_v10, %v1415_v7  ;;  %v1442_v32 = vmul.f32 %v1438_v26, %v3080_v39  ;;  %v1101_v52 = vmul.f32 %v1097_v36, %v1045_v4  ;;  %v1121_v49 = vmul.f32 3.0, %v3075_v60 }
 0x1d6   : >> { %v1450_v51 = vmul.f32 %v1446_v3, %v1270_v8  ;;  %v1214_v46 = vmul.f32 %v1210_v11, %v2956_v18  ;;  %v1222_v9 = vmul.f32 %v1218_v50, %v3038_v53  ;;  %vm1065_vm8 = vcmp.ge.f32.partialorder %v2987_v35, 1.0 }
 0x1d7   : >> { %3397 = vst [vmem:[#allocation6_spill] sm:$0xff] %v3095_v20  ;;  %vm1068_vm10 = vcmp.ge.f32.partialorder %v2910_v23, 1.0  ;;  %v3103_v44 = vmul.f32 %v1543_v42, %v1534_v54  ;;  %v1555_v10 = vmul.f32 %v1547_v40, %v1535_v45  ;;  %vm1069_vm11 = vmxor %vm1065_vm8, %vm2078_vm4  ;;  %v1117_v7 = vadd.f32 %v1113_v16, %v1101_v52  ;;  %v1387_v52 = vpop.permute.xlu0 %1386 }
 0x1d8   : >> { %v3109_v5 = vadd.f32 -1.0, %v2987_v35  ;;  %v1399_v2 = vmul.f32 %v2914_v14, %v1379_v56  ;;  %v1093_v18 = vmul.f32 %v1089_v29, %v1045_v4  ;;  %v1226_v57 = vadd.f32 %v1222_v9, %v1214_v46  ;;  %vm1073_vm12 = vmand %vm1049_vm5, %vm1069_vm11 }
 0x1d9   : >> { %v1831_v53 = vadd.f32 0.001, %v2987_v35  ;;  %v1125_v58 = vmul.f32 %v1121_v49, %v1061_v63  ;;  %v1077_v37 = vsel %vm1073_vm12, 1.0, %v3392_v15  ;;  %v1197_v26 = vmul.f32 -1.5, %v3078_v27  ;;  %vm3145_vm13 = vmxor %vm1068_vm10, %vm2078_vm4 }
 0x1da   : >> { %v1133_v36 = vmul.f32 -3.0, %v3109_v5  ;;  %v1454_v33 = vadd.f32 %v1450_v51, %v1442_v32  ;;  %v1177_v3 = vmul.f32 -2.9910269, %v3075_v60  ;;  %v1362_v54 = vmul.f32 1.4977534, %v2951_v1  ;;  %vm1076_vm4 = vmand %vm1052_vm14, %vm3145_vm13 }
 0x1db   : >> { %v1370_v14 = vmul.f32 -1.0, %v3009_v30  ;;  %v1189_v56 = vmul.f32 2.9910269, %v1831_v53  ;;  %v1201_v45 = vmul.f32 %v1197_v26, %v1117_v7  ;;  %v1209_v29 = vmul.f32 1.5, %v2987_v35 }
 0x1dc   : >> { %v1137_v4 = vmul.f32 %v1133_v36, %v1077_v37  ;;  %v1366_v63 = vmul.f32 %v1362_v54, %v2979_v31  ;;  %v1482_v11 = vmul.f32 2.9865606, %v2941_v0  ;;  %v1844_v50 = vadd.f32 -1.002, %v2901_v17 }
 0x1dd   : >> { %v1374_v16 = vmul.f32 %v1370_v14, %v1226_v57  ;;  %v1193_v49 = vmul.f32 %v1189_v56, %v1093_v18  ;;  %v1213_v51 = vmul.f32 %v1209_v29, %v1117_v7  ;;  %v1217_v1 = vmul.f32 -1.5, %v3109_v5 }
 0x1de   : >> { %v3125_v32 = vadd.f32 %v1137_v4, %v1125_v58  ;;  %v3129_v30 = vmul.f32 %v3069_v62, %v1454_v33  ;;  %v3131_v42 = vadd.f32 %v1555_v10, %v1399_v2  ;;  %v1281_v40 = vmul.f32 -2.9865606, %v3075_v60  ;;  %v3155_v33 = vpop.permute.xlu1 %1295  ;;  %v1511_v4 = vpop.permute.xlu0 %1510 }
 0x1df   : >> { %v1486_v31 = vmul.f32 %v1482_v11, %v1270_v8  ;;  %v1205_v46 = vadd.f32 %v1201_v45, %v1193_v49  ;;  %v1494_v9 = vmul.f32 -500.0, %v1844_v50  ;;  %v1839_v36 = vadd.f32 0.0015, %v2987_v35 }
 0x1e0   : >> { %3398 = vst [vmem:[#allocation11_spill] sm:$0xff] %v3131_v42  ;;  %v1221_v0 = vmul.f32 %v1217_v1, %v3125_v32  ;;  %v1181_v58 = vmul.f32 %v1177_v3, %v1093_v18  ;;  %v1378_v26 = vadd.f32 %v1374_v16, %v1366_v63  ;;  %v1361_v54 = vmul.f32 1.4977534, %v1831_v53 }
 0x1e1   : >> { %v1406_v7 = vmul.f32 -1.4977534, %v3024_v28  ;;  %v1498_v62 = vmul.f32 %v1494_v9, %v3063_v38  ;;  %v1329_v10 = vmul.f32 -1.4977534, %v3078_v27  ;;  %v1145_v2 = vmul.f32 3.0, %v3078_v27 }
 0x1e2   : >> { %v3137_v14 = vadd.f32 %v1221_v0, %v1213_v51  ;;  %v1402_v18 = vmul.f32 %v1226_v57, %v2901_v17  ;;  %v3152_v28 = vadd.f32 -1.001, %v2987_v35  ;;  %v1169_v38 = vmul.f32 1000.0, %v3109_v5 }
 0x1e3   : >> { %v1410_v53 = vmul.f32 %v1406_v7, %v3080_v39  ;;  %v1369_v3 = vmul.f32 -1.0, %v3109_v5  ;;  %v1502_v56 = vadd.f32 %v1498_v62, %v1486_v31  ;;  %v1321_v45 = vmul.f32 2.9865606, %v1839_v36  ;;  %v3191_v62 = vpop.permute.xlu0 %1342 }
 0x1e4   : >> { %v1333_v29 = vmul.f32 %v1329_v10, %v1205_v46  ;;  %v3158_v63 = vmul.f32 %v1281_v40, %v1181_v58  ;;  %v1149_v16 = vmul.f32 %v1145_v2, %v1077_v37  ;;  %v1157_v17 = vmul.f32 -1000.0, %v3152_v28 }
 0x1e5   : >> { %v3162_v39 = vadd.f32 -1.0015, %v2987_v35  ;;  %v1365_v57 = vmul.f32 %v1361_v54, %v1205_v46  ;;  %v1373_v11 = vmul.f32 %v1369_v3, %v3137_v14  ;;  %v1325_v50 = vmul.f32 %v1321_v45, %v1181_v58 }
 0x1e6   : >> { %v1081_v49 = vsel %vm1065_vm8, 1.0, %v3392_v15  ;;  %v3172_v51 = vmul.f32 %v1387_v52, %v1378_v26  ;;  %v3174_v37 = vadd.f32 %v1410_v53, %v1402_v18  ;;  %v3176_v31 = vmul.f32 %v1511_v4, %v1502_v56  ;;  %v3187_v26 = vpop.permute.xlu1 %1382 }
 0x1e7   : >> { %v1161_v1 = vmul.f32 %v1157_v17, %v1081_v49  ;;  %v1173_v40 = vmul.f32 %v1169_v38, %v1081_v49  ;;  %v3178_v0 = vadd.f32 %v1333_v29, %v1325_v50  ;;  %v1249_v9 = vmul.f32 2.9910269, %v3078_v27 }
 0x1e8   : >> { %v1273_v46 = vmul.f32 666.6667, %v3109_v5  ;;  %v1261_v58 = vmul.f32 -666.6667, %v3162_v39  ;;  %v1080_v54 = vsel %vm1076_vm4, 1.0, %v3392_v15  ;;  %v3185_v52 = vadd.f32 -1.0, %v2910_v23 }
 0x1e9   : >> { %v1165_v36 = vadd.f32 %v1161_v1, %v1149_v16  ;;  %v3189_v7 = vadd.f32 %v1373_v11, %v1365_v57  ;;  %v1843_v10 = vadd.f32 -1.002, %v2987_v35  ;;  %v1148_v2 = vmul.f32 3.0, %v2974_v55 }
 0x1ea   : >> { %v3196_v8 = vadd.f32 -1.001, %v2910_v23  ;;  %v1265_v53 = vmul.f32 %v1261_v58, %v1173_v40  ;;  %v1136_v38 = vmul.f32 -3.0, %v3185_v52  ;;  %v1172_v3 = vmul.f32 1000.0, %v3185_v52 }
 0x1eb   : >> { %v1253_v18 = vmul.f32 %v1249_v9, %v1165_v36  ;;  %v1481_v4 = vmul.f32 2.9865606, %v3078_v27  ;;  %v1084_v56 = vsel %vm1068_vm10, 1.0, %v3392_v15  ;;  %v1152_v45 = vmul.f32 %v1148_v2, %v1080_v54 }
 0x1ec   : >> { %v1160_v29 = vmul.f32 -1000.0, %v3196_v8  ;;  %v1140_v17 = vmul.f32 %v1136_v38, %v1080_v54  ;;  %v1176_v57 = vmul.f32 %v1172_v3, %v1084_v56  ;;  %v1838_v11 = vadd.f32 -1.0015, %v2910_v23  ;;  %v1471_v54 = vpop.permute.xlu0 %1470 }
 0x1ed   : >> { %v1269_v16 = vadd.f32 %v1265_v53, %v1253_v18  ;;  %v3206_v50 = vmul.f32 %v1273_v46, %v1173_v40  ;;  %v1493_v49 = vmul.f32 -500.0, %v1843_v10  ;;  %v1360_v9 = vmul.f32 %v2831_v6, %v3051_v34  ;;  %v3214_v18 = vpop.permute.xlu1 %1422 }
 0x1ee   : >> { %v1164_v1 = vmul.f32 %v1160_v29, %v1084_v56  ;;  %v1144_v27 = vadd.f32 %v1140_v17, %v3042_v59  ;;  %v1232_v58 = vmul.f32 1.5, %v2966_v41  ;;  %v1252_v2 = vmul.f32 2.9910269, %v2974_v55 }
 0x1ef   : >> { %v1276_v15 = vmul.f32 666.6667, %v3185_v52  ;;  %v1240_v40 = vmul.f32 -2.9910269, %v3196_v8  ;;  %v1264_v46 = vmul.f32 -666.6667, %v1838_v11  ;;  %v1485_v38 = vmul.f32 %v1481_v4, %v1269_v16 }
 0x1f0   : >> { %v1168_v53 = vadd.f32 %v1164_v1, %v1152_v45  ;;  %v1846_v10 = vadd.f32 -1.002, %v2910_v23  ;;  %v1236_v3 = vmul.f32 %v1232_v58, %v1144_v27  ;;  %v1440_v59 = vmul.f32 1.4977534, %v2966_v41 }
 0x1f1   : >> { %v1280_v6 = vmul.f32 %v1276_v15, %v1176_v57  ;;  %v1268_v29 = vmul.f32 %v1264_v46, %v1176_v57  ;;  %v1229_v17 = vmul.f32 1.5, %v3075_v60  ;;  %v1497_v42 = vmul.f32 %v1493_v49, %v3206_v50  ;;  %v1507_v57 = vpop.permute.xlu1 %1506  ;;  %v1459_v49 = vpop.permute.xlu0 %1458 }
 0x1f2   : >> { %v1244_v34 = vmul.f32 %v1240_v40, %v1168_v53  ;;  %v1256_v56 = vmul.f32 %v1252_v2, %v1168_v53  ;;  %v1448_v20 = vmul.f32 -2.9865606, %v1838_v11  ;;  %v1496_v61 = vmul.f32 -500.0, %v1846_v10 }
 0x1f3   : >> { %v1237_v45 = vmul.f32 -2.9910269, %v3152_v28  ;;  %v1484_v22 = vmul.f32 2.9865606, %v2974_v55  ;;  %v1233_v4 = vmul.f32 %v1229_v17, %v3125_v32  ;;  %v1501_v15 = vadd.f32 %v1497_v42, %v1485_v38 }
 0x1f4   : >> { %v1248_v1 = vadd.f32 %v1244_v34, %v1236_v3  ;;  %v1272_v47 = vadd.f32 %v1268_v29, %v1256_v56  ;;  %v1500_v58 = vmul.f32 %v1496_v61, %v1280_v6  ;;  %v1445_v2 = vmul.f32 -2.9865606, %v3162_v39 }
 0x1f5   : >> { %v1241_v41 = vmul.f32 %v1237_v45, %v1165_v36  ;;  %v1212_v11 = vmul.f32 1.5, %v2910_v23  ;;  %v1437_v3 = vmul.f32 1.4977534, %v3075_v60  ;;  %v1220_v55 = vmul.f32 -1.5, %v3185_v52  ;;  %v1539_v45 = vpop.permute.xlu1 %1538 }
 0x1f6   : >> { %v1444_v53 = vmul.f32 %v1440_v59, %v1248_v1  ;;  %v1452_v40 = vmul.f32 %v1448_v20, %v1272_v47  ;;  %v1488_v46 = vmul.f32 %v1484_v22, %v1272_v47  ;;  %v1449_v34 = vmul.f32 %v1445_v2, %v1269_v16 }
 0x1f7   : >> { %v1245_v10 = vadd.f32 %v1241_v41, %v1233_v4  ;;  %v1216_v61 = vmul.f32 %v1212_v11, %v2997_v19  ;;  %v1364_v42 = vmul.f32 1.4977534, %v2984_v21  ;;  %v1529_v39 = vmul.f32 500.0, %v3109_v5  ;;  %v3404_v11 = vld [vmem:[#allocation6_spill] sm:$0xff] }
 0x1f8   : >> { %v1456_v56 = vadd.f32 %v1452_v40, %v1444_v53  ;;  %v1504_v32 = vadd.f32 %v1500_v58, %v1488_v46  ;;  %v1224_v20 = vmul.f32 %v1220_v55, %v1144_v27  ;;  %v1408_v22 = vmul.f32 -1.4977534, %v3196_v8  ;;  %v3402_v53 = vld [vmem:[#allocation13_spill] sm:$0xff] }
 0x1f9   : >> { %v1441_v36 = vmul.f32 %v1437_v3, %v1245_v10  ;;  %v1368_v60 = vmul.f32 %v1364_v42, %v3017_v12  ;;  %v1372_v16 = vmul.f32 -1.0, %v3185_v52  ;;  %v1532_v19 = vmul.f32 500.0, %v3185_v52 }
 0x1fa   : >> { %v1476_v47 = vmul.f32 %v1471_v54, %v1456_v56  ;;  %v1524_v38 = vmul.f32 %v2836_v25, %v1504_v32  ;;  %v1228_v29 = vadd.f32 %v1224_v20, %v1216_v61  ;;  %v1412_v17 = vmul.f32 %v1408_v22, %v1248_v1  ;;  %v1431_v54 = vpop.permute.xlu0 %1430 }
 0x1fb   : >> { %v1453_v59 = vadd.f32 %v1449_v34, %v1441_v36  ;;  %v1357_v21 = vmul.f32 %v3191_v62, %v3178_v0  ;;  %v1533_v8 = vmul.f32 %v1529_v39, %v3206_v50  ;;  %v1397_v25 = vmul.f32 %v3187_v26, %v3189_v7 }
 0x1fc   : >> { %v1480_v5 = vadd.f32 %v1476_v47, %v3048_v24  ;;  %v1528_v27 = vadd.f32 %v1524_v38, %v1360_v9  ;;  %v1376_v12 = vmul.f32 %v1372_v16, %v1228_v29  ;;  %v1404_v4 = vmul.f32 %v1228_v29, %v2910_v23  ;;  %v1601_v16 = vld [vmem:[%s3331_s5] sm:$0xf] }
 0x1fd   : >> { %v1536_v58 = vmul.f32 %v1532_v19, %v1280_v6  ;;  %v1521_v1 = vmul.f32 %v1507_v57, %v1501_v15  ;;  %v1401_v52 = vmul.f32 %v3137_v14, %v2987_v35  ;;  %v1405_v0 = vmul.f32 -1.4977534, %v3152_v28  ;;  %v1595_v57 = vpop.permute.xlu1 %1594 }
 0x1fe   : >> { %v1568_v41 = vadd.f32 %v1528_v27, %v1480_v5  ;;  %v1478_v24 = vadd.f32 %v3129_v30, %v3035_v13  ;;  %v1473_v62 = vmul.f32 %v1459_v49, %v1453_v59  ;;  %v1380_v50 = vadd.f32 %v1376_v12, %v1368_v60  ;;  %v3401_v13 = vld [vmem:[#allocation12_spill] sm:$0xff]  ;;  %v1419_v40 = vpop.permute.xlu0 %1418 }
 0x1ff   : >> { %v1416_v9 = vadd.f32 %v1412_v17, %v1404_v4  ;;  %v1313_v26 = vmul.f32 %v3155_v33, %v3158_v63  ;;  %v1558_v23 = vadd.f32 %v3103_v44, %v3172_v51  ;;  %v1553_v7 = vmul.f32 %v1539_v45, %v1533_v8  ;;  %v3403_v33 = vld [vmem:[#allocation17_spill] sm:$0xff] }
 0x200   : >> { %v1409_v6 = vmul.f32 %v1405_v0, %v1245_v10  ;;  %v1526_v15 = vadd.f32 %v3176_v31, %v3040_v48  ;;  %v1434_v35 = vmul.f32 %v3214_v18, %v3174_v37  ;;  %v1400_v14 = vmul.f32 %v2834_v43, %v1380_v50  ;;  %v3405_v48 = vld [vmem:[#allocation11_spill] sm:$0xff] }
 0x201   : >> { %v1556_v30 = vmul.f32 %v3401_v13, %v1536_v58  ;;  %v1525_v28 = vadd.f32 %v1521_v1, %v1357_v21  ;;  %v1557_v2 = vadd.f32 %v1553_v7, %v1397_v25  ;;  %v1567_v63 = vadd.f32 %v3403_v33, %v3402_v53  ;;  %v1590_v32 = vpop.permute.xlu1 %1589 }
 0x202   : >> { %v1413_v44 = vadd.f32 %v1409_v6, %v1401_v52  ;;  %v1477_v51 = vadd.f32 %v1473_v62, %v1313_v26  ;;  %v1436_v46 = vmul.f32 %v1431_v54, %v1416_v9  ;;  %v1571_v31 = vadd.f32 %v3405_v48, %v3404_v11  ;;  %v1585_v39 = vpop.permute.xlu0 %1584 }
 0x203   : >> { %v1560_v49 = vadd.f32 %v1556_v30, %v1400_v14  ;;  %v1570_v10 = vadd.f32 %v1558_v23, %v1434_v35  ;;  %v1566_v43 = vadd.f32 %v1526_v15, %v1478_v24  ;;  %v3406_v22 = vmov 0.0  }
 0x204   : >> { %v1433_v18 = vmul.f32 %v1419_v40, %v1413_v44  ;;  %v1575_v3 = vadd.f32 %v1571_v31, %v1567_v63  ;;  %v1565_v55 = vadd.f32 %v1525_v28, %v1477_v51  ;;  %vm1608_vm14 = vcmask 261120  }
 0x205   : >> { %v1572_v37 = vadd.f32 %v1560_v49, %v1436_v46  ;;  %v1574_v61 = vadd.f32 %v1570_v10, %v1566_v43  ;;  %v1580_v38 = vpop.permute.xlu1 %1579 }
 0x206   : >> { %v1569_v34 = vadd.f32 %v1557_v2, %v1433_v18  ;;  %v1599_v36 = vadd.f32 %v1590_v32, %v1575_v3 }
 0x207   : >> { %v1576_v56 = vadd.f32 %v1572_v37, %v1568_v41  ;;  %v1598_v47 = vadd.f32 %v1585_v39, %v1574_v61 }
 0x208   : >> { %v1573_v20 = vadd.f32 %v1569_v34, %v1565_v55 }
 0x209   : >> { %v1600_v42 = vadd.f32 %v1595_v57, %v1576_v56  ;;  %v1606_v59 = vpop.permute.xlu1 %1605 }
 0x20a   : >> { %v1597_v60 = vadd.f32 %v1580_v38, %v1573_v20 }
 0x20b   : >> { %1878 = vmatpush3.msra.mxu1 %v1600_v42 }
 0x20c   : >> { %1879 = vmatprep.subr.mxu1 %v3406_v22 }
 0x20d   : >> { %1880 = vmatpush3.msra.mxu1 %v1599_v36 }
 0x20e   : >> { %1881 = vmatprep.subr.mxu1 %v3406_v22 }
 0x20f   : >> { %1882 = vmatpush3.msra.mxu1 %v1598_v47 }
 0x210   : >> { %1883 = vmatprep.subr.mxu1 %v3406_v22 }
 0x211   : >> { %1884 = vmatpush3.msra.mxu1 %v1597_v60 }
 0x212   : >> { %1886 = vmatmul.mubr.msk.f32.vlgmr.msra.gmra.mxu1 %vm1608_vm14, %v1601_v16 }
 0x2d1   : > { %287 = sbr.rel (!%p285_p11) target bundleno = 22 (0x16), region = 92 }
 0x2d2   : >> { %v1678_v29 = vpop.f32.mrf.mxu1 }
 0x2d3   : >> { %v1679_v17 = vadd.f32 %v1678_v29, %v1606_v59 }
 0x2d4   : >> { %v1887_v19 = vpop.f32.mrf.mxu1 }
 0x2d5   : >> { %1684 = vst [vmem:[%s1683_s16] sm:$0xf] %v1679_v17 }
 0x2d6   : > { %2011 = shalt.err (!%p2008_p4)
}
 0x2d7   : > { %s2012_s15 = scalar_lea.hbm %s3278_s13, 128  ;;  %s2016_s16 = scalar_lea.hbm %s3333_s7, 256 }
 0x2d8   : > { %p2013_p7 = scmp.ne.s32.totalorder %s3278_s13, %s2012_s15  ;;  %p2017_p10 = scmp.lt.s32.totalorder %s3278_s13, %s3333_s7 }
 0x2d9   : > { %p2018_p11 = scmp.lt.s32.totalorder %s2016_s16, %s2012_s15 }
 0x2da   : > { %p2014_p8 = pnand %p2013_p7, %p2161_p5 }
 0x2db   : > { %p2019_p12 = por %p2018_p11, %p2017_p10 }
 0x2dc   : > { %p2015_p9 = pneg %p2014_p8 }
 0x2de   : > { %p2020_p13 = pnand %p2019_p12, %p2015_p9 }
 0x2e0   : > { %2023 = shalt.err (!%p2020_p13)
}
 0x2e1   : > { %s2081_s18 = smov 64   ;;  %s2082_s23 = smov 4  }
 0x2e2   : > { %1888 = dma.vmem_to_hbm [thread:$0]  (%p2161_p5), %s3282_s22, 128, %s3278_s13, %s3286_s21, %s2081_s18, %s2081_s18, %s2082_s23  }
 0x2e3 PF: > { %p1894_p0 = scmp.ge.s32.totalorder %s2062_s27, 2  ;;  %s1714_s19 = sand.u32 1, %s2050_s24  }
 0x2e4   : > { %s1715_s28 = scalar_lea.sflag [#allocation3], %s1714_s19 }
 0x2e5   : > { %p1891_p1 = pnand %p1894_p0, %p2165_p6 }
 0x2e7   : > { %p1892_p2 = pneg %p1891_p1 }
 0x2e9   : > { %2045 = dma.done.wait (%p1892_p2), %s1715_s28, 128  }
 0x2ea   : > { %2047 = vsyncadd (%p1892_p2), %s1715_s28, 4294967168  ;;  %p17_p3 = scmp.ge.s32.totalorder %s2148_s30, 4   ;;  %s3408_s24 = smov %s2054_s25 }
 0x2eb   : > { %s3409_s25 = smov %s2058_s26  ;;  %s3410_s26 = smov %s2159_s10 }
 0x2ec   : > { %s3411_s27 = smov %s2148_s30  ;;  %19 = sbr.rel (!%p17_p3) target bundleno = 3 (0x3), region = 103 }
 0x2f1   :  { %1720 = vsyncpa [#allocation3], 1 }
 0x2f2   :  { %1722 = vsyncpa [#allocation3 + $0x1], 1 }

</bundles_post_ra>
